<compile_context>
chip_gen: v6e
topology: v6e:2x2x1
jax: 0.10.0
libtpu: 0.0.40
codegen_flags: <defaults>
</compile_context>

<pallas_src>
import jax
import jax.numpy as jnp
from jax.experimental import pallas as pl
from jax.experimental.pallas import tpu as pltpu


def _round_up(x, m):
    return ((x + m - 1) // m) * m


def classifier_kernel(xp_ref, mt_ref, wf5_ref, bc_ref, wcap_ref, wcls_ref,
                      bcls_ref, out_ref):
    """One grid step == B sequences.

    xp_ref   : (B, Sp, E)  bf16  zero-halo padded embeddings (real tokens at rows 2..S+1)
    mt_ref   : (B, 1, So)  f32   mask over the So conv-output positions
    wf5_ref  : (E, 5*C3)   bf16  fused shift-in-weights conv weight (tap j -> lanes j*C3:(j+1)*C3)
    bc_ref   : (1, 1, C3)  f32   fused conv bias [b1|b2|b3]
    wcap_ref : (C3, D8)    bf16  surrogate capsule projection
    wcls_ref : (D8, CP)    bf16  classifier weight, zero-padded to CP lanes
    bcls_ref : (1, CP)     f32
    out_ref  : (B, CP)     f32   sigmoid logits (lane-dense, tile-exact block)
    """
    B, Sp, E = xp_ref.shape
    So = mt_ref.shape[-1]
    C3 = bc_ref.shape[-1]

    # --- all 5 conv taps in ONE 2D MXU matmul (shift-in-weights) --------------
    xflat = xp_ref[...].reshape(B * Sp, E)                       # bf16
    y = jnp.dot(xflat, wf5_ref[...],
                preferred_element_type=jnp.float32)              # (B*Sp, 5*C3) f32
    y = y.reshape(B, Sp, 5 * C3)

    # Combine tap contributions: acc[b, s, :] = sum_j y[b, s+j, j*C3:(j+1)*C3]
    acc = y[:, 0:So, 0:C3]
    for j in range(1, 5):
        acc = acc + y[:, j:j + So, j * C3:(j + 1) * C3]
    r = jnp.maximum(acc + bc_ref[...], 0.0)                      # (B, So, C3) f32

    # --- masked mean pooling on the MXU: (B,1,So) @ (B,So,C3) -----------------
    bmm = (((2,), (1,)), ((0,), (0,)))
    m = mt_ref[...]                                              # (B, 1, So) f32
    pooled = jax.lax.dot_general(m, r, dimension_numbers=bmm,
                                 preferred_element_type=jnp.float32)  # (B,1,C3)
    denom = jnp.sum(m, axis=-1, keepdims=True) + 1e-6            # (B, 1, 1)
    pooled = pooled * pl.reciprocal(denom, approx=True)
    pooled = pooled.reshape(B, C3)                               # (B, C3) f32

    # TODO(synk): the `routing` capsule module source is not provided with the
    # reference file; surrogate = linear projection of the mask-weighted global
    # mean to 8*D, followed by a capsule squash.
    caps = jnp.dot(pooled.astype(jnp.bfloat16), wcap_ref[...],
                   preferred_element_type=jnp.float32)           # (B, D8)
    sq = jnp.sum(caps * caps, axis=-1, keepdims=True)            # (B, 1)
    caps = caps * (sq / (1.0 + sq)) * jax.lax.rsqrt(sq + 1e-9)

    logit = jnp.dot(caps.astype(jnp.bfloat16), wcls_ref[...],
                    preferred_element_type=jnp.float32) + bcls_ref[...]
    out_ref[...] = jax.nn.sigmoid(logit)                         # (B, CP)


def classifier_forward(x_ids, mask, params, pad_idx=0, max_len=600,
                       batch_block=16, vmem_limit_bytes=None):
    N, S = x_ids.shape
    if S > max_len:
        x_ids = x_ids[:, :max_len]
        mask = mask[:, :max_len]
        S = max_len

    emb = params["embeddings"]                       # (V, E)
    V, E = emb.shape
    C = params["w1"].shape[-1]
    C3 = 3 * C
    D8 = params["wcap"].shape[-1]
    classes = params["wcls"].shape[-1]
    CP = _round_up(max(classes, 1), 128)             # lane-dense output width

    # So: conv output positions (mult of 8 for clean reshapes / pooling width).
    # Sp: padded rows = 2-row front halo + tokens + >=2-row back halo, mult of 16
    #     so the bf16 (B,Sp,E) <-> (B*Sp,E) reshape needs no sublane repacking.
    So = _round_up(S, 8)
    Sp = _round_up(So + 4, 16)

    # Batch block: multiple of 8 -> tile-exact (B, CP) output stores.
    B = _round_up(max(1, min(batch_block, N)), 8)
    N_pad = _round_up(N, B)

    # --- fused conv weights, shift-in-weights layout (shift j == offset j) ----
    wf = jnp.zeros((5, E, C3), jnp.float32)
    wf = wf.at[1:4, :, 0:C].set(params["w1"])            # conv1 (K=3, pad 1)
    wf = wf.at[0:4, :, C:2 * C].set(params["w2"])        # conv2 (K=4, pad 2, crop last)
    wf = wf.at[:, :, 2 * C:3 * C].set(params["w3"])      # conv3 (K=5, pad 2)
    wf5 = jnp.transpose(wf, (1, 0, 2)).reshape(E, 5 * C3).astype(jnp.bfloat16)
    bc = jnp.concatenate([params["b1"], params["b2"], params["b3"]],
                         axis=-1).reshape(1, 1, C3).astype(jnp.float32)

    wcap = params["wcap"].astype(jnp.bfloat16)                        # (C3, D8)
    wcls = jnp.zeros((D8, CP), jnp.float32).at[:, :classes].set(
        params["wcls"]).astype(jnp.bfloat16)
    bcls = jnp.zeros((1, CP), jnp.float32).at[0, :classes].set(
        params["bcls"].reshape(-1))

    # --- embedding gather with a dedicated zero row for halo / padding --------
    # (in-sequence pad tokens still look up embeddings[pad_idx], matching
    #  F.embedding where padding_idx only affects gradients)
    emb_ext = jnp.concatenate([emb, jnp.zeros((1, E), emb.dtype)], axis=0)
    zero_id = V
    ids = jnp.full((N_pad, Sp), zero_id, dtype=jnp.int32)
    ids = ids.at[:N, 2:S + 2].set(x_ids.astype(jnp.int32))
    xp = jnp.take(emb_ext, ids, axis=0).astype(jnp.bfloat16)    # (N_pad, Sp, E)

    m_t = jnp.zeros((N_pad, 1, So), jnp.float32).at[:N, 0, :S].set(
        mask.astype(jnp.float32))

    grid_spec = pltpu.PrefetchScalarGridSpec(
        num_scalar_prefetch=0,
        grid=(N_pad // B,),
        in_specs=[
            pl.BlockSpec((B, Sp, E), lambda n: (n, 0, 0)),
            pl.BlockSpec((B, 1, So), lambda n: (n, 0, 0)),
            pl.BlockSpec((E, 5 * C3), lambda n: (0, 0)),
            pl.BlockSpec((1, 1, C3), lambda n: (0, 0, 0)),
            pl.BlockSpec((C3, D8), lambda n: (0, 0)),
            pl.BlockSpec((D8, CP), lambda n: (0, 0)),
            pl.BlockSpec((1, CP), lambda n: (0, 0)),
        ],
        out_specs=pl.BlockSpec((B, CP), lambda n: (n, 0)),
    )

    cp_kwargs = dict(dimension_semantics=("parallel",))
    if vmem_limit_bytes is not None:
        cp_kwargs["vmem_limit_bytes"] = vmem_limit_bytes

    out = pl.pallas_call(
        classifier_kernel,
        out_shape=jax.ShapeDtypeStruct((N_pad, CP), jnp.float32),
        grid_spec=grid_spec,
        compiler_params=pltpu.CompilerParams(**cp_kwargs),
    )(xp, m_t, wf5, bc, wcap, wcls, bcls)

    return out[:N, :classes]


# ------------------------- pure-JAX reference (f32) ---------------------------
def reference_forward(x_ids, mask, params):
    emb = params["embeddings"]
    N, S = x_ids.shape
    x = jnp.take(emb, x_ids, axis=0)                        # F.embedding forward
    xh = jnp.pad(x, ((0, 0), (2, 2), (0, 0)))               # 2-row zero halo

    def branch(w, b, offsets):
        out = jnp.zeros((N, S, w.shape[-1]), jnp.float32)
        for t, j in enumerate(offsets):
            out = out + jnp.einsum("nse,ec->nsc", xh[:, j:j + S, :], w[t])
        return jax.nn.relu(out + b[None])

    c1 = branch(params["w1"], params["b1"], (1, 2, 3))          # K=3, pad 1
    c2 = branch(params["w2"], params["b2"], (0, 1, 2, 3))       # K=4, pad 2, crop last
    c3 = branch(params["w3"], params["b3"], (0, 1, 2, 3, 4))    # K=5, pad 2
    r = jnp.concatenate([c1, c2, c3], axis=-1)                  # (N, S, 3C)

    m = mask.astype(jnp.float32)
    pooled = (r * m[:, :, None]).sum(1) / (m.sum(1, keepdims=True) + 1e-6)
    caps = pooled @ params["wcap"]
    sq = (caps * caps).sum(-1, keepdims=True)
    caps = caps * (sq / (1.0 + sq)) * jax.lax.rsqrt(sq + 1e-9)
    logit = caps @ params["wcls"] + params["bcls"]
    return jax.nn.sigmoid(logit)


def init_params(key, vocab, words_dim, output_channel, D, classes_num):
    ks = jax.random.split(key, 9)
    s = 0.1
    return {
        "embeddings": s * jax.random.normal(ks[0], (vocab, words_dim), jnp.float32),
        "w1": s * jax.random.normal(ks[1], (3, words_dim, output_channel), jnp.float32),
        "b1": s * jax.random.normal(ks[2], (1, output_channel), jnp.float32),
        "w2": s * jax.random.normal(ks[3], (4, words_dim, output_channel), jnp.float32),
        "b2": s * jax.random.normal(ks[4], (1, output_channel), jnp.float32),
        "w3": s * jax.random.normal(ks[5], (5, words_dim, output_channel), jnp.float32),
        "b3": s * jax.random.normal(ks[6], (1, output_channel), jnp.float32),
        "wcap": s * jax.random.normal(ks[7], (3 * output_channel, 8 * D), jnp.float32),
        "wcls": s * jax.random.normal(ks[8], (8 * D, classes_num), jnp.float32),
        "bcls": jnp.zeros((1, classes_num), jnp.float32),
    }


if __name__ == "__main__":
    N, S = 32, 16                    # 2 grid steps at batch_block=16
    vocab, words_dim = 50, 32        # embedding table (V, E)
    output_channel = 8               # config.output_channel -> 3C = 24
    D = 4                            # config.D -> capsule out dim 8*D = 32
    classes_num = 5
    pad_idx = 0

    key = jax.random.PRNGKey(0)
    kp, kx = jax.random.split(key)
    params = init_params(kp, vocab, words_dim, output_channel, D, classes_num)

    x_ids = jax.random.randint(kx, (N, S), 1, vocab, dtype=jnp.int32)
    x_ids = x_ids.at[:, -4:].set(pad_idx)     # trailing padding tokens
    x_ids = x_ids.at[0, -8:].set(pad_idx)
    mask = (x_ids != pad_idx).astype(jnp.float32)

    logits = classifier_forward(x_ids, mask, params, pad_idx=pad_idx,
                                batch_block=16)
    logits = jax.block_until_ready(logits)
    assert logits.shape == (N, classes_num)
    assert bool(jnp.all(jnp.isfinite(logits)))

    ref = reference_forward(x_ids, mask, params)
    err = float(jnp.max(jnp.abs(logits - ref)))
    assert err < 3e-2, f"max abs diff vs reference = {err}"
    print("KERNEL_OK")
</pallas_src>

<mosaic_0001>
module attributes {stable_mosaic.version = 11 : i64} {
  func.func @classifier_kernel(%arg0: i32, %arg1: memref<16x32x32xbf16, #tpu.memory_space<vmem>>, %arg2: memref<16x1x16xf32, #tpu.memory_space<vmem>>, %arg3: memref<32x120xbf16, #tpu.memory_space<vmem>>, %arg4: memref<1x1x24xf32, #tpu.memory_space<vmem>>, %arg5: memref<24x32xbf16, #tpu.memory_space<vmem>>, %arg6: memref<32x128xbf16, #tpu.memory_space<vmem>>, %arg7: memref<1x128xf32, #tpu.memory_space<vmem>>, %arg8: memref<16x128xf32, #tpu.memory_space<vmem>>) attributes {dimension_semantics = [#tpu.dimension_semantics<parallel>], iteration_bounds = array<i64: 2>, scalar_prefetch = 0 : i64, scratch_operands = 0 : i64, tpu.core_type = #tpu.core_type<tc>, window_params = [{transform_indices = @transform_0, window_bounds = array<i64: 16, 32, 32>}, {transform_indices = @transform_1, window_bounds = array<i64: 16, 1, 16>}, {pipeline_mode = #tpu.pipeline_mode<synchronous>, transform_indices = @transform_2, window_bounds = array<i64: 32, 120>}, {pipeline_mode = #tpu.pipeline_mode<synchronous>, transform_indices = @transform_3, window_bounds = array<i64: 1, 1, 24>}, {pipeline_mode = #tpu.pipeline_mode<synchronous>, transform_indices = @transform_4, window_bounds = array<i64: 24, 32>}, {pipeline_mode = #tpu.pipeline_mode<synchronous>, transform_indices = @transform_5, window_bounds = array<i64: 32, 128>}, {pipeline_mode = #tpu.pipeline_mode<synchronous>, transform_indices = @transform_6, window_bounds = array<i64: 1, 128>}, {transform_indices = @transform_7, window_bounds = array<i64: 16, 128>}]} {
    %c0 = arith.constant 0 : index
    %c0_0 = arith.constant 0 : index
    %c0_1 = arith.constant 0 : index
    %0 = vector.load %arg1[%c0, %c0_0, %c0_1] : memref<16x32x32xbf16, #tpu.memory_space<vmem>>, vector<16x32x32xbf16>
    %1 = vector.shape_cast %0 : vector<16x32x32xbf16> to vector<512x32xbf16>
    %c0_2 = arith.constant 0 : index
    %c0_3 = arith.constant 0 : index
    %2 = vector.load %arg3[%c0_2, %c0_3] : memref<32x120xbf16, #tpu.memory_space<vmem>>, vector<32x120xbf16>
    %cst = arith.constant dense<0.000000e+00> : vector<512x120xf32>
    %3 = tpu.matmul %1, %2, %cst {dimension_numbers = #tpu.dot_dimension_numbers<[1], [0], [0], [1], [0, 0, 1, 1], [], []>} : vector<512x32xbf16>, vector<32x120xbf16>, vector<512x120xf32> -> vector<512x120xf32>
    %4 = vector.shape_cast %3 : vector<512x120xf32> to vector<16x32x120xf32>
    %5 = vector.extract_strided_slice %4 {offsets = [0, 0, 0], sizes = [16, 16, 24], strides = [1, 1, 1]} : vector<16x32x120xf32> to vector<16x16x24xf32>
    %6 = vector.extract_strided_slice %4 {offsets = [0, 1, 24], sizes = [16, 16, 24], strides = [1, 1, 1]} : vector<16x32x120xf32> to vector<16x16x24xf32>
    %7 = arith.addf %5, %6 : vector<16x16x24xf32>
    %8 = vector.extract_strided_slice %4 {offsets = [0, 2, 48], sizes = [16, 16, 24], strides = [1, 1, 1]} : vector<16x32x120xf32> to vector<16x16x24xf32>
    %9 = arith.addf %7, %8 : vector<16x16x24xf32>
    %10 = vector.extract_strided_slice %4 {offsets = [0, 3, 72], sizes = [16, 16, 24], strides = [1, 1, 1]} : vector<16x32x120xf32> to vector<16x16x24xf32>
    %11 = arith.addf %9, %10 : vector<16x16x24xf32>
    %12 = vector.extract_strided_slice %4 {offsets = [0, 4, 96], sizes = [16, 16, 24], strides = [1, 1, 1]} : vector<16x32x120xf32> to vector<16x16x24xf32>
    %13 = arith.addf %11, %12 : vector<16x16x24xf32>
    %c0_4 = arith.constant 0 : index
    %c0_5 = arith.constant 0 : index
    %c0_6 = arith.constant 0 : index
    %14 = vector.load %arg4[%c0_4, %c0_5, %c0_6] : memref<1x1x24xf32, #tpu.memory_space<vmem>>, vector<1x1x24xf32>
    %15 = vector.broadcast %14 : vector<1x1x24xf32> to vector<16x16x24xf32>
    %16 = arith.addf %13, %15 : vector<16x16x24xf32>
    %cst_7 = arith.constant 0.000000e+00 : f32
    %17 = vector.broadcast %cst_7 : f32 to vector<16x16x24xf32>
    %18 = arith.maximumf %16, %17 : vector<16x16x24xf32>
    %c0_8 = arith.constant 0 : index
    %c0_9 = arith.constant 0 : index
    %c0_10 = arith.constant 0 : index
    %19 = vector.load %arg2[%c0_8, %c0_9, %c0_10] : memref<16x1x16xf32, #tpu.memory_space<vmem>>, vector<16x1x16xf32>
    %cst_11 = arith.constant dense<0.000000e+00> : vector<16x1x24xf32>
    %20 = tpu.matmul %19, %18, %cst_11 {dimension_numbers = #tpu.dot_dimension_numbers<[2], [1], [1], [2], [0, 0, 0, 1, 1, 2], [0], [0]>} : vector<16x1x16xf32>, vector<16x16x24xf32>, vector<16x1x24xf32> -> vector<16x1x24xf32>
    %cst_12 = arith.constant dense<0.000000e+00> : vector<16x1xf32>
    %21 = vector.multi_reduction <add>, %19, %cst_12 [2] : vector<16x1x16xf32> to vector<16x1xf32>
    %22 = vector.shape_cast %21 : vector<16x1xf32> to vector<16x1x1xf32>
    %cst_13 = arith.constant 9.99999997E-7 : f32
    %23 = vector.broadcast %cst_13 : f32 to vector<16x1x1xf32>
    %24 = arith.addf %22, %23 : vector<16x1x1xf32>
    %25 = tpu.reciprocal %24 {approx = true} : vector<16x1x1xf32> -> vector<16x1x1xf32>
    %26 = vector.broadcast %25 : vector<16x1x1xf32> to vector<16x1x24xf32>
    %27 = arith.mulf %20, %26 : vector<16x1x24xf32>
    %28 = vector.shape_cast %27 : vector<16x1x24xf32> to vector<16x24xf32>
    %29 = arith.truncf %28 : vector<16x24xf32> to vector<16x24xbf16>
    %c0_14 = arith.constant 0 : index
    %c0_15 = arith.constant 0 : index
    %30 = vector.load %arg5[%c0_14, %c0_15] : memref<24x32xbf16, #tpu.memory_space<vmem>>, vector<24x32xbf16>
    %cst_16 = arith.constant dense<0.000000e+00> : vector<16x32xf32>
    %31 = tpu.matmul %29, %30, %cst_16 {dimension_numbers = #tpu.dot_dimension_numbers<[1], [0], [0], [1], [0, 0, 1, 1], [], []>} : vector<16x24xbf16>, vector<24x32xbf16>, vector<16x32xf32> -> vector<16x32xf32>
    %32 = arith.mulf %31, %31 : vector<16x32xf32>
    %cst_17 = arith.constant dense<0.000000e+00> : vector<16xf32>
    %33 = vector.multi_reduction <add>, %32, %cst_17 [1] : vector<16x32xf32> to vector<16xf32>
    %34 = vector.shape_cast %33 : vector<16xf32> to vector<16x1xf32>
    %cst_18 = arith.constant 1.000000e+00 : f32
    %35 = vector.broadcast %cst_18 : f32 to vector<16x1xf32>
    %36 = arith.addf %35, %34 : vector<16x1xf32>
    %37 = arith.divf %34, %36 : vector<16x1xf32>
    %38 = vector.broadcast %37 : vector<16x1xf32> to vector<16x32xf32>
    %39 = arith.mulf %31, %38 : vector<16x32xf32>
    %cst_19 = arith.constant 9.99999971E-10 : f32
    %40 = vector.broadcast %cst_19 : f32 to vector<16x1xf32>
    %41 = arith.addf %34, %40 : vector<16x1xf32>
    %42 = math.rsqrt %41 : vector<16x1xf32>
    %43 = vector.broadcast %42 : vector<16x1xf32> to vector<16x32xf32>
    %44 = arith.mulf %39, %43 : vector<16x32xf32>
    %45 = arith.truncf %44 : vector<16x32xf32> to vector<16x32xbf16>
    %c0_20 = arith.constant 0 : index
    %c0_21 = arith.constant 0 : index
    %46 = vector.load %arg6[%c0_20, %c0_21] : memref<32x128xbf16, #tpu.memory_space<vmem>>, vector<32x128xbf16>
    %cst_22 = arith.constant dense<0.000000e+00> : vector<16x128xf32>
    %47 = tpu.matmul %45, %46, %cst_22 {dimension_numbers = #tpu.dot_dimension_numbers<[1], [0], [0], [1], [0, 0, 1, 1], [], []>} : vector<16x32xbf16>, vector<32x128xbf16>, vector<16x128xf32> -> vector<16x128xf32>
    %c0_23 = arith.constant 0 : index
    %c0_24 = arith.constant 0 : index
    %48 = vector.load %arg7[%c0_23, %c0_24] : memref<1x128xf32, #tpu.memory_space<vmem>>, vector<1x128xf32>
    %49 = vector.broadcast %48 : vector<1x128xf32> to vector<16x128xf32>
    %50 = arith.addf %47, %49 : vector<16x128xf32>
    %51 = arith.negf %50 : vector<16x128xf32>
    %52 = math.exp %51 : vector<16x128xf32>
    %cst_25 = arith.constant 1.000000e+00 : f32
    %53 = vector.broadcast %cst_25 : f32 to vector<16x128xf32>
    %54 = arith.addf %53, %52 : vector<16x128xf32>
    %55 = arith.divf %53, %54 : vector<16x128xf32>
    %c0_26 = arith.constant 0 : index
    %c0_27 = arith.constant 0 : index
    %56 = vector.load %arg8[%c0_26, %c0_27] : memref<16x128xf32, #tpu.memory_space<vmem>>, vector<16x128xf32>
    tpu.vector_store %arg8[%c0_26, %c0_27], %55 {strides = array<i32>} : memref<16x128xf32, #tpu.memory_space<vmem>>, vector<16x128xf32>,
    return
  }
  func.func @transform_0(%arg0: i32) -> (i32, i32, i32) {
    %c0_i32 = arith.constant 0 : i32
    %c0_i32_0 = arith.constant 0 : i32
    %c0_i32_1 = arith.constant 0 : i32
    return %arg0, %c0_i32, %c0_i32_0 : i32, i32, i32
  }
  func.func @transform_1(%arg0: i32) -> (i32, i32, i32) {
    %c0_i32 = arith.constant 0 : i32
    %c0_i32_0 = arith.constant 0 : i32
    %c0_i32_1 = arith.constant 0 : i32
    return %arg0, %c0_i32, %c0_i32_0 : i32, i32, i32
  }
  func.func @transform_2(%arg0: i32) -> (i32, i32) {
    %c0_i32 = arith.constant 0 : i32
    %c0_i32_0 = arith.constant 0 : i32
    %c0_i32_1 = arith.constant 0 : i32
    return %c0_i32, %c0_i32_0 : i32, i32
  }
  func.func @transform_3(%arg0: i32) -> (i32, i32, i32) {
    %c0_i32 = arith.constant 0 : i32
    %c0_i32_0 = arith.constant 0 : i32
    %c0_i32_1 = arith.constant 0 : i32
    %c0_i32_2 = arith.constant 0 : i32
    return %c0_i32, %c0_i32_0, %c0_i32_1 : i32, i32, i32
  }
  func.func @transform_4(%arg0: i32) -> (i32, i32) {
    %c0_i32 = arith.constant 0 : i32
    %c0_i32_0 = arith.constant 0 : i32
    %c0_i32_1 = arith.constant 0 : i32
    return %c0_i32, %c0_i32_0 : i32, i32
  }
  func.func @transform_5(%arg0: i32) -> (i32, i32) {
    %c0_i32 = arith.constant 0 : i32
    %c0_i32_0 = arith.constant 0 : i32
    %c0_i32_1 = arith.constant 0 : i32
    return %c0_i32, %c0_i32_0 : i32, i32
  }
  func.func @transform_6(%arg0: i32) -> (i32, i32) {
    %c0_i32 = arith.constant 0 : i32
    %c0_i32_0 = arith.constant 0 : i32
    %c0_i32_1 = arith.constant 0 : i32
    return %c0_i32, %c0_i32_0 : i32, i32
  }
  func.func @transform_7(%arg0: i32) -> (i32, i32) {
    %c0_i32 = arith.constant 0 : i32
    %c0_i32_0 = arith.constant 0 : i32
    return %arg0, %c0_i32 : i32, i32
  }
}

</mosaic_0001>

<bundles_post_ra>
// kernel: tpu_custom_call.1
= control target key start
LH: loop header
LB: loop body
LE: loop exit
PB: predicated region body
PF: predicated region fallthrough
CT: control target
= control target key end

     0   :  { %12 = vsyncpa [#allocation3], 0  ;;  %s5318_s0 = inlined_call_operand.hbm [shape: bf16[32,32,32], index: 0, kind: input, shape index: {}]   ;;  %s5319_s1 = inlined_call_operand.vmem [shape: f32[32,1,16], index: 1, kind: input, shape index: {}]   ;;  %s5320_s2 = inlined_call_operand.vmem [shape: bf16[32,120], index: 2, kind: input, shape index: {}]   ;;  %s5321_s3 = inlined_call_operand.vmem [shape: f32[1,1,24], index: 3, kind: input, shape index: {}]   ;;  %s5322_s4 = inlined_call_operand.vmem [shape: bf16[24,32], index: 4, kind: input, shape index: {}]   ;;  %s5323_s5 = inlined_call_operand.vmem [shape: bf16[32,128], index: 5, kind: input, shape index: {}]   ;;  %s5324_s6 = inlined_call_operand.vmem [shape: f32[1,128], index: 6, kind: input, shape index: {}]   ;;  %s5325_s7 = inlined_call_operand.hbm [shape: f32[32,128], index: 7, kind: output, shape index: {}]  }
   0x1   :  { %14 = vsyncpa [#allocation3 + $0x1], 0 }
   0x2   :  { %15 = vsyncpa [#allocation4], 0 }
   0x3   :  { %17 = vsyncpa [#allocation4 + $0x1], 0  ;;  %s4199_s24 = smov 0   ;;  %s4201_s25 = smov 0  }
   0x4   :  { %s4203_s26 = smov 0   ;;  %s4205_s27 = smov 0  }
   0x5 LB: > { %s4220_s28 = sadd.s32 4294967295, %s4145_s27   ;;  %s3511_s29 = sadd.s32 4294967294, %s4145_s27   ;;  %s4145_s27 = sphi %s4205_s27, %s5355_s27   ;;  %s4141_s26 = sphi %s4203_s26, %s5354_s26   ;;  %s4137_s25 = sphi %s4201_s25, %s5353_s25   ;;  %s4133_s24 = sphi %s4199_s24, %s5352_s24  }
   0x6   : > { %s4224_s30 = sadd.s32 1, %s4145_s27   ;;  %s30_s8 = sadd.s32 1, %s4141_s26 }
   0x7   : > { %s27_s9 = ssub.s32 %s4145_s27, %s4224_s30  ;;  %p37_p0 = scmp.ne.s32.totalorder %s4141_s26, %s4137_s25 }
   0x8   : > { %p28_p1 = scmp.eq.s32.totalorder %s27_s9, 0  ;;  %p38_p2 = scmp.eq.s32.totalorder %s4145_s27, 0 }
   0x9   : > { %p43_p3 = scmp.ne.s32.totalorder %s4137_s25, %s4133_s24  ;;  %p44_p4 = scmp.eq.s32.totalorder %s4220_s28, 0 }
   0xa   : > { %s4236_s10 = scalar_select %p28_p1, %s4141_s26, %s30_s8  }
   0xb   : > { %p4238_p5 = por %p38_p2, %p37_p0  ;;  %p4242_p6 = por %p44_p4, %p43_p3 }
   0xc   : > { %p198_p7 = scmp.eq.s32.totalorder %s4220_s28, 1  ;;  %p204_p8 = scmp.eq.s32.totalorder %s3511_s29, 1 }
   0xd   : > { %s5333_s12 = scalar_select %p4242_p6, 1, 0 }
   0xe   : > { %p3922_p10 = scmp.lt.s32.totalorder %s4145_s27, 2  ;;  %p4249_p11 = por %p198_p7, %p37_p0 }
   0xf   : > { %p4253_p12 = por %p204_p8, %p43_p3  ;;  %s239_s15 = sand.u32 1, %s4141_s26  }
  0x10   : > { %s5334_s13 = scalar_select %p4249_p11, 1, 0 }
  0x11   : > { %s5335_s14 = scalar_select %p4253_p12, 1, 0 }
  0x12   : > { %s3620_s16 = sshll.u32 %s4145_s27, 12  ;;  %s3514_s17 = sshll.u32 %s239_s15, 8 }
  0x13   : > { %s4262_s20 = scalar_lea.hbm %s5318_s0, %s3620_s16  ;;  %s243_s21 = scalar_lea.vmem [#allocation2], %s3514_s17 }
  0x14   : > { %s251_s22 = sshll.u32 %s243_s21, 4  ;;  %p4266_p13 = pnand %p3922_p10, %p4238_p5  ;;  %s4270_s22 = int_to_ptr.vmem [resolvable:$true] %s251_s22 }
  0x15   : > { %s4272_s29 = scalar_lea.sflag [#allocation3], %s239_s15  ;;  %s4053_s8 = scalar_lea.hbm %s4262_s20, 4096 }
  0x16   : > { %p4054_p0 = scmp.ne.s32.totalorder %s4262_s20, %s4053_s8  ;;  %p4055_p1 = pneg %p4266_p13 }
  0x17   : > { %s4058_s17 = scalar_lea.hbm %s5318_s0, 8192  ;;  %p4059_p4 = scmp.lt.s32.totalorder %s4262_s20, %s5318_s0 }
  0x18   : > { %p4056_p2 = pnand %p4055_p1, %p4054_p0  ;;  %p4060_p5 = scmp.lt.s32.totalorder %s4058_s17, %s4053_s8 }
  0x1a   : > { %p4057_p3 = pneg %p4056_p2  ;;  %p4061_p7 = por %p4060_p5, %p4059_p4 }
  0x1c   : > { %p4062_p8 = pnand %p4061_p7, %p4057_p3 }
  0x1e   : > { %4065 = shalt.err (!%p4062_p8)
}
  0x1f   : > { %s4066_s15 = scalar_lea.vmem %s4270_s22, 4096  ;;  %s4147_s19 = smov [#allocation2]  }
  0x20   : > { %p4067_p10 = scmp.ne.s32.totalorder %s4270_s22, %s4066_s15  ;;  %s4071_s21 = sshll.u32 %s4147_s19, 4  ;;  %s4072_s21 = int_to_ptr.vmem [resolvable:$false] %s4071_s21 }
  0x21   : > { %s4073_s9 = scalar_lea.vmem %s4072_s21, 8192  ;;  %p4074_p2 = scmp.lt.s32.totalorder %s4270_s22, %s4072_s21 }
  0x22   : > { %p4069_p9 = pnand %p4067_p10, %p4055_p1  ;;  %p4075_p12 = scmp.lt.s32.totalorder %s4073_s9, %s4066_s15 }
  0x24   : > { %p4070_p0 = pneg %p4069_p9  ;;  %p4076_p11 = por %p4075_p12, %p4074_p2 }
  0x26   : > { %p4077_p6 = pnand %p4076_p11, %p4070_p0 }
  0x28   : > { %4080 = shalt.err (!%p4077_p6)
}
  0x29   : > { %s4148_s8 = smov 64   ;;  %s4149_s16 = smov 4  }
  0x2a   : > { %3917 = dma.hbm_to_vmem [thread:$0]  (!%p4266_p13), %s4262_s20, 4096, %s4270_s22, %s4272_s29, %s4148_s8, %s4148_s8, %s4149_s16  }
  0x2b   : > { %p3518_p9 = scmp.ge.s32.totalorder %s4145_s27, 1  ;;  %p267_p1 = scmp.lt.s32.totalorder %s4145_s27, 3 }
  0x2d   : > { %p268_p3 = pnand %p3518_p9, %p267_p1 }
  0x2f   : > { %271 = sbr.rel (%p268_p3) target bundleno = 1454 (0x5ae), region = 48 }
  0x34   : > { %s4296_s17 = sand.u32 1, %s4137_s25   ;;  %p5337_p6 = scmp.ne.s32.totalorder %s5333_s12, 0 }
  0x35   : > { %s3519_s11 = sshll.u32 %s4296_s17, 8  ;;  %s274_s18 = scalar_lea.sflag [#allocation3], %s4296_s17 }
  0x36   : > { %s4300_s15 = scalar_lea.vmem [#allocation2], %s3519_s11 }
  0x37   : > { %4124 = dma.done.wait (%p5337_p6), %s274_s18, 4096  }
  0x38   : > { %4126 = vsyncadd (%p5337_p6), %s274_s18, 4294963200  ;;  %v3966_v0 = vld [vmem:[%s5320_s2 + $0x8] sm:$0xff]   ;;  %v3967_v1 = vld [vmem:[%s5320_s2] sm:$0xff]   ;;  %vm560_vm0 = vcmask 261120   ;;  %vm1187_vm1 = vcmask 1045504   ;;  %vm978_vm2 = vcmask 1046528  }
  0x39   : > { %3710 = vmatprep.subr.bf16.mxu0 %v3966_v0  ;;  %v3968_v2 = vld [vmem:[%s4300_s15] sm:$0xff]   ;;  %3906 = vmatprep.subr.bf16.mxu1 %v3966_v0  ;;  %v3969_v4 = vld [vmem:[%s4300_s15 + $0x8] sm:$0xff]   ;;  %v3972_v6 = vld [vmem:[%s4300_s15 + $0x10] sm:$0xff]   ;;  %s4150_s12 = smov 80   ;;  %s4151_s19 = smov 104   ;;  %vm1396_vm3 = vcmask 1044480  }
  0x3a   : > { %3711 = vmatpush3.bf16.msra.mxu0 %v3966_v0  ;;  %3908 = vmatpush3.bf16.msra.mxu1 %v3966_v0  ;;  %v3970_v3 = vld [vmem:[%s4300_s15 + $0xe0] sm:$0xff]   ;;  %v3971_v5 = vld [vmem:[%s4300_s15 + $0xe8] sm:$0xff]   ;;  %v3974_v7 = vld [vmem:[%s4300_s15 + $0xf0] sm:$0xff]   ;;  %s4152_s21 = smov 56   ;;  %vm1605_vm4 = vcmask 1043456   ;;  %s4153_s9 = smov 32  }
  0x3b   : > { %3712 = vmatprep.subr.bf16.mxu0 %v3967_v1  ;;  %3714 = vmatprep.mubr.msk.bf16.mxu0 %vm560_vm0, %v3968_v2  ;;  %v3973_v8 = vld [vmem:[%s4300_s15 + $0x18] sm:$0xff]   ;;  %v3976_v10 = vld [vmem:[%s4300_s15 + $0x20] sm:$0xff]   ;;  %v3977_v11 = vld [vmem:[%s4300_s15 + $0x28] sm:$0xff]   ;;  %vm4155_vm5 = vmmov 0   ;;  %s3521_s8 = sshll.u32 %s4220_s28, 4  ;;  %vm1901_vm6 = vcmask 130048  }
  0x3c   : > { %3907 = vmatprep.subr.bf16.mxu1 %v3967_v1  ;;  %3770 = vmatprep.mubr.msk.bf16.mxu1 %vm560_vm0, %v3970_v3  ;;  %v3975_v9 = vld [vmem:[%s4300_s15 + $0xf8] sm:$0xff]   ;;  %v3978_v12 = vld [vmem:[%s4300_s15 + $0x30] sm:$0xff]   ;;  %v3980_v14 = vld [vmem:[%s4300_s15 + $0x40] sm:$0xff]   ;;  %p314_p11 = scmp.lt.s32.totalorder %s3521_s8, 31  ;;  %vm3070_vm7 = vcmask 122880   ;;  %vm3219_vm8 = vcmask 1041409  }
  0x3d   : > { %v3979_v13 = vld [vmem:[%s4300_s15 + $0x38] sm:$0xff]   ;;  %v3981_v15 = vld [vmem:[%s4300_s15 + $0x48] sm:$0xff]   ;;  %v3982_v16 = vld [vmem:[%s4300_s15 + $0x50] sm:$0xff]   ;;  %vm3222_vm9 = vcmask 1042434   ;;  %vm3225_vm10 = vcmask 1043459   ;;  %vm3228_vm11 = vcmask 1044484  }
  0x3e   : > { %3713 = vmatpush3.bf16.msra.mxu0 %v3967_v1  ;;  %3909 = vmatpush3.bf16.msra.mxu1 %v3967_v1  ;;  %v3983_v17 = vld [vmem:[%s4300_s15 + $0x58] sm:$0xff]   ;;  %v3984_v18 = vld [vmem:[%s4300_s15 + $0x60] sm:$0xff]   ;;  %v3985_v19 = vld [vmem:[%s4300_s15 + $0x68] sm:$0xff]   ;;  %s5357_s8 = smov (!%p314_p11, %s3521_s8), 31  ;;  %vm3231_vm12 = vcmask 1045509   ;;  %vm3234_vm13 = vcmask 1046534  }
  0x3f   : > { %v3986_v20 = vld [vmem:[%s4300_s15 + $0x70] sm:$0xff]   ;;  %v3987_v21 = vld [vmem:[%s4300_s15 + $0x78] sm:$0xff]   ;;  %v3988_v22 = vld [vmem:[%s4300_s15 + $0x80] sm:$0xff]   ;;  %s4730_s20 = scalar_lea.vmem %s5319_s1, %s5357_s8  ;;  %vm3237_vm14 = vcmask 1047559   ;;  %vm3263_vm15 = vcmask 195584   ;;  %s3621_s22 = sshll.u32 %s4220_s28, 8 }
  0x40   : > { %v3989_v23 = vld [vmem:[%s4300_s15 + $0x88] sm:$0xff]   ;;  %v3990_v24 = vld [vmem:[%s4300_s15 + $0x90] sm:$0xff]   ;;  %v3991_v25 = vld [vmem:[%s4300_s15 + $0x98] sm:$0xff]   ;;  %p5349_p13 = scmp.ne.s32.totalorder %s5334_s13, 0  ;;  %s4156_s28 = smov [#allocation5]  }
  0x41   : > { %3715 = vmatmul.mubr.msk.bf16.vlgmr.msra.gmra.mxu0 %vm560_vm0, %v3969_v4  ;;  %3771 = vmatmul.mubr.msk.bf16.vlgmr.msra.gmra.mxu1 %vm560_vm0, %v3971_v5  ;;  %v3992_v26 = vld [vmem:[%s4300_s15 + $0xa0] sm:$0xff]   ;;  %v3993_v27 = vld [vmem:[%s4300_s15 + $0xa8] sm:$0xff]   ;;  %v3994_v28 = vld [vmem:[%s4300_s15 + $0xb0] sm:$0xff]   ;;  %s4085_s16 = sshll.u32 %s4156_s28, 4  ;;  %s4086_s16 = int_to_ptr.vmem [resolvable:$false] %s4085_s16 }
  0x42   : > { %3718 = vmatprep.mubr.msk.bf16.mxu0 %vm560_vm0, %v3972_v6  ;;  %3774 = vmatprep.mubr.msk.bf16.mxu1 %vm560_vm0, %v3974_v7  ;;  %v3995_v29 = vld [vmem:[%s4300_s15 + $0xb8] sm:$0xff]   ;;  %v3996_v30 = vld [vmem:[%s4300_s15 + $0xc0] sm:$0xff]   ;;  %v3997_v31 = vld [vmem:[%s4300_s15 + $0xc8] sm:$0xff]   ;;  %s4087_s11 = scalar_lea.vmem %s4086_s16, 512 }
  0x43   : > { %v3998_v32 = vld [vmem:[%s4300_s15 + $0xd0] sm:$0xff]   ;;  %v3999_v33 = vld [vmem:[%s4300_s15 + $0xd8] sm:$0xff]  }
  0x49   : > { %3719 = vmatmul.mubr.msk.bf16.gmra.mxu0 %vm560_vm0, %v3973_v8  ;;  %3775 = vmatmul.mubr.msk.bf16.gmra.mxu1 %vm560_vm0, %v3975_v9 }
  0x4a   : > { %3722 = vmatprep.mubr.msk.bf16.mxu0 %vm560_vm0, %v3976_v10 }
  0x51   : > { %3723 = vmatmul.mubr.msk.bf16.gmra.mxu0 %vm560_vm0, %v3977_v11 }
  0x52   : > { %3726 = vmatprep.mubr.msk.bf16.mxu0 %vm560_vm0, %v3978_v12 }
  0x59   : > { %3727 = vmatmul.mubr.msk.bf16.gmra.mxu0 %vm560_vm0, %v3979_v13 }
  0x5a   : > { %3730 = vmatprep.mubr.msk.bf16.mxu0 %vm560_vm0, %v3980_v14 }
  0x61   : > { %3731 = vmatmul.mubr.msk.bf16.gmra.mxu0 %vm560_vm0, %v3981_v15 }
  0x62   : > { %3734 = vmatprep.mubr.msk.bf16.mxu0 %vm560_vm0, %v3982_v16 }
  0x69   : > { %3735 = vmatmul.mubr.msk.bf16.gmra.mxu0 %vm560_vm0, %v3983_v17 }
  0x6a   : > { %3738 = vmatprep.mubr.msk.bf16.mxu0 %vm560_vm0, %v3984_v18  ;;  %v5330_v18 = vmov 0.0  }
  0x6b   : > { %3778 = vmatprep.subr.mxu1 %v5330_v18  ;;  %3782 = vmatprep.mubr.msk.f32.mxu1 %vm4155_vm5, %v5330_v18 }
  0x71   : > { %3739 = vmatmul.mubr.msk.bf16.gmra.mxu0 %vm560_vm0, %v3985_v19 }
  0x72   : > { %3742 = vmatprep.mubr.msk.bf16.mxu0 %vm560_vm0, %v3986_v20 }
  0x79   : > { %3743 = vmatmul.mubr.msk.bf16.gmra.mxu0 %vm560_vm0, %v3987_v21 }
  0x7a   : > { %3746 = vmatprep.mubr.msk.bf16.mxu0 %vm560_vm0, %v3988_v22 }
  0x81   : > { %3747 = vmatmul.mubr.msk.bf16.gmra.mxu0 %vm560_vm0, %v3989_v23 }
  0x82   : > { %3750 = vmatprep.mubr.msk.bf16.mxu0 %vm560_vm0, %v3990_v24 }
  0x89   : > { %3751 = vmatmul.mubr.msk.bf16.gmra.mxu0 %vm560_vm0, %v3991_v25 }
  0x8a   : > { %3754 = vmatprep.mubr.msk.bf16.mxu0 %vm560_vm0, %v3992_v26 }
  0x91   : > { %3755 = vmatmul.mubr.msk.bf16.gmra.mxu0 %vm560_vm0, %v3993_v27 }
  0x92   : > { %3758 = vmatprep.mubr.msk.bf16.mxu0 %vm560_vm0, %v3994_v28 }
  0x99   : > { %3759 = vmatmul.mubr.msk.bf16.gmra.mxu0 %vm560_vm0, %v3995_v29 }
  0x9a   : > { %3762 = vmatprep.mubr.msk.bf16.mxu0 %vm560_vm0, %v3996_v30 }
  0xa1   : > { %3763 = vmatmul.mubr.msk.bf16.gmra.mxu0 %vm560_vm0, %v3997_v31 }
  0xa2   : > { %3766 = vmatprep.mubr.msk.bf16.mxu0 %vm560_vm0, %v3998_v32 }
  0xa9   : > { %3767 = vmatmul.mubr.msk.bf16.gmra.mxu0 %vm560_vm0, %v3999_v33 }
 0x101   : > { %v3716_v34 = vpop.f32.mrf.mxu0  ;;  %v4376_v35 = vpop.f32.mrf.mxu1 }
 0x102   : > { %v1191_v43 = vrot.slane %v3716_v34, 2  ;;  %v982_v45 = vrot.slane %v3716_v34, 1  ;;  %v1400_v53 = vrot.slane %v3716_v34, 3  ;;  %v1609_v61 = vrot.slane %v3716_v34, 4 }
 0x103   : > { %v4378_v36 = vpop.f32.mrf.mxu0  ;;  %v4380_v37 = vpop.f32.mrf.mxu1  ;;  %v1052_v5 = vrot.slane %v4376_v35, 1  ;;  %v1261_v6 = vrot.slane %v4376_v35, 2  ;;  %v1470_v20 = vrot.slane %v4376_v35, 3  ;;  %v1679_v21 = vrot.slane %v4376_v35, 4 }
 0x104   : > { %v979_v54 = vrot.slane %v4378_v36, 1  ;;  %v1188_v62 = vrot.slane %v4378_v36, 2  ;;  %v1606_v3 = vrot.slane %v4378_v36, 4  ;;  %v1397_v4 = vrot.slane %v4378_v36, 3 }
 0x105   : > { %v3717_v38 = vpop.f32.mrf.mxu0  ;;  %v3773_v39 = vpop.f32.mrf.mxu1  ;;  %v1258_v16 = vrot.slane %v4380_v37, 2  ;;  %v1049_v17 = vrot.slane %v4380_v37, 1  ;;  %v1467_v28 = vrot.slane %v4380_v37, 3 }
 0x107   : > { %v4382_v40 = vpop.f32.mrf.mxu0  ;;  %v4384_v41 = vpop.f32.mrf.mxu1 }
 0x108   : > { %v1189_v42 = vrot.slane %v4382_v40, 2  ;;  %v980_v44 = vrot.slane %v4382_v40, 1  ;;  %v1398_v50 = vrot.slane %v4382_v40, 3  ;;  %v1607_v59 = vrot.slane %v4382_v40, 4 }
 0x109   : > { %v4388_v46 = vpop.f32.mrf.mxu0  ;;  %v4390_v47 = vpop.f32.mrf.mxu1  ;;  %v1259_v10 = vrot.slane %v4384_v41, 2  ;;  %v1050_v11 = vrot.slane %v4384_v41, 1  ;;  %v5328_v25 = vrot.slane %v4384_v41, 4  ;;  %v1468_v26 = vrot.slane %v4384_v41, 3 }
 0x10a   : > { %v1192_v48 = vsel %vm1187_vm1, %v1189_v42, %v1191_v43  ;;  %v983_v49 = vsel %vm978_vm2, %v980_v44, %v982_v45  ;;  %v1401_v57 = vsel %vm1396_vm3, %v1398_v50, %v1400_v53  ;;  %v981_v58 = vsel %vm978_vm2, %v979_v54, %v980_v44 }
 0x10b   : > { %1270 = vrot.lane.b32.xlu1 %v1192_v48, %s4150_s12  ;;  %1061 = vrot.lane.b32.xlu0 %v983_v49, %s4151_s19  ;;  %v4397_v51 = vpop.f32.mrf.mxu0  ;;  %v4399_v52 = vpop.f32.mrf.mxu1  ;;  %v1610_v0 = vsel %vm1605_vm4, %v1607_v59, %v1609_v61  ;;  %v1190_v1 = vsel %vm1187_vm1, %v1188_v62, %v1189_v42  ;;  %v1608_v8 = vsel %vm1605_vm4, %v1606_v3, %v1607_v59  ;;  %v987_v30 = vrot.slane %v4388_v46, 1 }
 0x10c   : > { %v1399_v9 = vsel %vm1396_vm3, %v1397_v4, %v1398_v50  ;;  %v1262_v14 = vsel %vm1187_vm1, %v1259_v10, %v1261_v6  ;;  %v1053_v15 = vsel %vm978_vm2, %v1050_v11, %v1052_v5  ;;  %v1260_v23 = vsel %vm1187_vm1, %v1258_v16, %v1259_v10 }
 0x10d   : > { %v3721_v55 = vpop.f32.mrf.mxu0  ;;  %v3777_v56 = vpop.f32.mrf.mxu1  ;;  %v1051_v24 = vsel %vm978_vm2, %v1049_v17, %v1050_v11  ;;  %v1680_v31 = vsel %vm1605_vm4, %v5328_v25, %v1679_v21  ;;  %v1471_v32 = vsel %vm1396_vm3, %v1468_v26, %v1470_v20  ;;  %v1196_v35 = vrot.slane %v4388_v46, 2 }
 0x10e   : > { %v1469_v39 = vsel %vm1396_vm3, %v1467_v28, %v1468_v26  ;;  %v984_v44 = vrot.slane %v4397_v51, 1  ;;  %v1405_v48 = vrot.slane %v4388_v46, 3  ;;  %v1193_v54 = vrot.slane %v4397_v51, 2 }
 0x10f   : > { %1479 = vrot.lane.b32.xlu1 %v1401_v57, %s4152_s21  ;;  %1059 = vrot.lane.b32.xlu0 %v981_v58, %s4151_s19  ;;  %v4407_v60 = vpop.f32.mrf.mxu0  ;;  %v1614_v57 = vrot.slane %v4388_v46, 4  ;;  %v1057_v46 = vrot.slane %v4390_v47, 1  ;;  %v1266_v10 = vrot.slane %v4390_v47, 2  ;;  %v1054_v17 = vrot.slane %v4399_v52, 1 }
 0x110   : > { %v985_v33 = vrot.slane %v4407_v60, 1  ;;  %v1194_v43 = vrot.slane %v4407_v60, 2  ;;  %v1403_v55 = vrot.slane %v4407_v60, 3  ;;  %v1612_v58 = vrot.slane %v4407_v60, 4 }
 0x111   : > { %v4410_v63 = vpop.f32.mrf.mxu0  ;;  %v1475_v21 = vrot.slane %v4390_v47, 3  ;;  %v1263_v28 = vrot.slane %v4399_v52, 2 }
 0x112   : > { %v988_v42 = vsel %vm978_vm2, %v985_v33, %v987_v30  ;;  %v1197_v50 = vsel %vm1187_vm1, %v1194_v43, %v1196_v35  ;;  %v986_v53 = vsel %vm978_vm2, %v984_v44, %v985_v33  ;;  %v1195_v61 = vsel %vm1187_vm1, %v1193_v54, %v1194_v43 }
 0x113   : > { %1688 = vrot.lane.b32.xlu1 %v1610_v0, %s4153_s9  ;;  %1268 = vrot.lane.b32.xlu0 %v1190_v1, %s4150_s12  ;;  %v4416_v2 = vpop.f32.mrf.mxu0  ;;  %v1406_v62 = vsel %vm1396_vm3, %v1403_v55, %v1405_v48  ;;  %v1402_v0 = vrot.slane %v4397_v51, 3  ;;  %v4489_v1 = vpop.f32.mrf.mxu1  ;;  %v1615_v5 = vsel %vm1605_vm4, %v1612_v58, %v1614_v57  ;;  %v1410_v57 = vrot.slane %v4410_v63, 3 }
 0x114   : > { %v1264_v16 = vrot.slane %v4489_v1, 2  ;;  %v5329_v26 = vrot.slane %v4489_v1, 3  ;;  %v989_v54 = vrot.slane %v4416_v2, 1 }
 0x115   : > { %v3725_v7 = vpop.f32.mrf.mxu0  ;;  %v1404_v6 = vsel %vm1396_vm3, %v1402_v0, %v1403_v55 }
 0x116   : > { %v1611_v7 = vrot.slane %v4397_v51, 4  ;;  %v1476_v35 = vsel %vm1396_vm3, %v5329_v26, %v1475_v21 }
 0x117   : > { %1686 = vrot.lane.b32.xlu1 %v1608_v8, %s4153_s9  ;;  %1477 = vrot.lane.b32.xlu0 %v1399_v9, %s4152_s21  ;;  %v4428_v12 = vpop.f32.mrf.mxu0  ;;  %v1055_v8 = vrot.slane %v4489_v1, 1 }
 0x118   : > { %v1617_v0 = vrot.slane %v4428_v12, 4 }
 0x119   : > { %v4430_v13 = vpop.f32.mrf.mxu0 }
 0x11b   : > { %1326 = vrot.lane.b32.xlu1 %v1262_v14, %s4150_s12  ;;  %1117 = vrot.lane.b32.xlu0 %v1053_v15, %s4151_s19  ;;  %v4439_v19 = vpop.f32.mrf.mxu0  ;;  %v1613_v14 = vsel %vm1605_vm4, %v1611_v7, %v1612_v58  ;;  %v1058_v15 = vsel %vm978_vm2, %v1055_v8, %v1057_v46  ;;  %v1619_v58 = vrot.slane %v4410_v63, 4  ;;  %v1408_v46 = vrot.slane %v4428_v12, 3 }
 0x11d   : > { %v3729_v22 = vpop.f32.mrf.mxu0  ;;  %v1620_v7 = vsel %vm1605_vm4, %v1617_v0, %v1619_v58 }
 0x11f   : > { %1324 = vrot.lane.b32.xlu1 %v1260_v23, %s4150_s12  ;;  %1115 = vrot.lane.b32.xlu0 %v1051_v24, %s4151_s19  ;;  %v4449_v27 = vpop.f32.mrf.mxu0  ;;  %v1267_v23 = vsel %vm1187_vm1, %v1264_v16, %v1266_v10  ;;  %v1056_v24 = vsel %vm978_vm2, %v1054_v17, %v1055_v8  ;;  %v1616_v8 = vrot.slane %v4416_v2, 4  ;;  %v1407_v10 = vrot.slane %v4416_v2, 3 }
 0x120   : > { %v1413_v58 = vrot.slane %v4449_v27, 3 }
 0x121   : > { %v4452_v29 = vpop.f32.mrf.mxu0  ;;  %v1618_v17 = vsel %vm1605_vm4, %v1616_v8, %v1617_v0  ;;  %v1409_v21 = vsel %vm1396_vm3, %v1407_v10, %v1408_v46  ;;  %v1621_v0 = vrot.slane %v4439_v19, 4 }
 0x122   : > { %v1211_v8 = vrot.slane %v4452_v29, 2 }
 0x123   : > { %1744 = vrot.lane.b32.xlu1 %v1680_v31, %s4153_s9  ;;  %1535 = vrot.lane.b32.xlu0 %v1471_v32, %s4152_s21  ;;  %v4462_v34 = vpop.f32.mrf.mxu0  ;;  %v992_v31 = vrot.slane %v4410_v63, 1  ;;  %v1201_v32 = vrot.slane %v4410_v63, 2  ;;  %v1411_v63 = vsel %vm1396_vm3, %v1408_v46, %v1410_v57  ;;  %v1622_v57 = vrot.slane %v4449_v27, 4 }
 0x124   : > { %v1412_v46 = vrot.slane %v4439_v19, 3 }
 0x125   : > { %v3733_v38 = vpop.f32.mrf.mxu0 }
 0x126   : > { %v1265_v38 = vsel %vm1187_vm1, %v1263_v28, %v1264_v16 }
 0x127   : > { %1533 = vrot.lane.b32.xlu0 %v1469_v39, %s4152_s21  ;;  %1065 = vrot.lane.b32.xlu1 %v988_v42, %s4151_s19  ;;  %v4471_v45 = vpop.f32.mrf.mxu0  ;;  %v1199_v39 = vrot.slane %v4428_v12, 2  ;;  %v990_v42 = vrot.slane %v4428_v12, 1 }
 0x129   : > { %v4474_v49 = vpop.f32.mrf.mxu0  ;;  %v1202_v48 = vsel %vm1187_vm1, %v1199_v39, %v1201_v32 }
 0x12b   : > { %1274 = vrot.lane.b32.xlu1 %v1197_v50, %s4150_s12  ;;  %1063 = vrot.lane.b32.xlu0 %v986_v53, %s4151_s19  ;;  %v4482_v56 = vpop.f32.mrf.mxu0  ;;  %v993_v50 = vsel %vm978_vm2, %v990_v42, %v992_v31  ;;  %v1198_v53 = vrot.slane %v4416_v2, 2 }
 0x12d   : > { %v3737_v59 = vpop.f32.mrf.mxu0 }
 0x12f   : > { %1272 = vrot.lane.b32.xlu1 %v1195_v61, %s4150_s12  ;;  %1483 = vrot.lane.b32.xlu0 %v1406_v62, %s4152_s21  ;;  %v4493_v3 = vpop.f32.mrf.mxu0  ;;  %v1200_v61 = vsel %vm1187_vm1, %v1198_v53, %v1199_v39  ;;  %v991_v62 = vsel %vm978_vm2, %v989_v54, %v990_v42  ;;  %v1415_v42 = vrot.slane %v4430_v13, 3 }
 0x131   : > { %v4498_v4 = vpop.f32.mrf.mxu0 }
 0x133   : > { %1692 = vrot.lane.b32.xlu1 %v1615_v5, %s4153_s9  ;;  %1481 = vrot.lane.b32.xlu0 %v1404_v6, %s4152_s21  ;;  %v4506_v9 = vpop.f32.mrf.mxu0 }
 0x135   : > { %v3741_v11 = vpop.f32.mrf.mxu0 }
 0x137   : > { %1690 = vrot.lane.b32.xlu1 %v1613_v14, %s4153_s9  ;;  %1121 = vrot.lane.b32.xlu0 %v1058_v15, %s4151_s19  ;;  %v4515_v20 = vpop.f32.mrf.mxu0  ;;  %v997_v14 = vrot.slane %v4430_v13, 1  ;;  %v1206_v15 = vrot.slane %v4430_v13, 2 }
 0x139   : > { %v4518_v22 = vpop.f32.mrf.mxu0 }
 0x13b   : > { %1330 = vrot.lane.b32.xlu1 %v1267_v23, %s4150_s12  ;;  %1119 = vrot.lane.b32.xlu0 %v1056_v24, %s4151_s19  ;;  %v4526_v30 = vpop.f32.mrf.mxu0  ;;  %v1204_v23 = vrot.slane %v4449_v27, 2  ;;  %v995_v24 = vrot.slane %v4449_v27, 1 }
 0x13d   : > { %v3745_v33 = vpop.f32.mrf.mxu0  ;;  %v1207_v32 = vsel %vm1187_vm1, %v1204_v23, %v1206_v15  ;;  %v1414_v15 = vsel %vm1396_vm3, %v1412_v46, %v1413_v58  ;;  %v1626_v46 = vrot.slane %v4462_v34, 4 }
 0x13e   : > { %v998_v33 = vsel %vm978_vm2, %v995_v24, %v997_v14  ;;  %v1623_v14 = vsel %vm1605_vm4, %v1621_v0, %v1622_v57 }
 0x13f   : > { %1539 = vrot.lane.b32.xlu1 %v1476_v35, %s4152_s21  ;;  %1328 = vrot.lane.b32.xlu0 %v1265_v38, %s4150_s12  ;;  %v4538_v43 = vpop.f32.mrf.mxu0  ;;  %v1203_v35 = vrot.slane %v4439_v19, 2  ;;  %v994_v38 = vrot.slane %v4439_v19, 1 }
 0x141   : > { %v4540_v44 = vpop.f32.mrf.mxu0  ;;  %v1205_v53 = vsel %vm1187_vm1, %v1203_v35, %v1204_v23  ;;  %v996_v54 = vsel %vm978_vm2, %v994_v38, %v995_v24  ;;  %v999_v35 = vrot.slane %v4462_v34, 1 }
 0x143   : > { %1278 = vrot.lane.b32.xlu1 %v1202_v48, %s4150_s12  ;;  %1069 = vrot.lane.b32.xlu0 %v993_v50, %s4151_s19  ;;  %v4548_v55 = vpop.f32.mrf.mxu0  ;;  %v1624_v48 = vrot.slane %v4430_v13, 4  ;;  %v1416_v13 = vsel %vm1396_vm3, %v1413_v58, %v1415_v42  ;;  %v1420_v42 = vrot.slane %v4452_v29, 3  ;;  %v1418_v58 = vrot.slane %v4471_v45, 3 }
 0x144   : > { %v1228_v25 = vrot.slane %v4548_v55, 2 }
 0x145   : > { %v3749_v59 = vpop.f32.mrf.mxu0 }
 0x147   : > { %1276 = vrot.lane.b32.xlu1 %v1200_v61, %s4150_s12  ;;  %1067 = vrot.lane.b32.xlu0 %v991_v62, %s4151_s19  ;;  %v4558_v5 = vpop.f32.mrf.mxu0  ;;  %v1625_v62 = vsel %vm1605_vm4, %v1622_v57, %v1624_v48  ;;  %v1629_v48 = vrot.slane %v4452_v29, 4  ;;  %v1627_v57 = vrot.slane %v4471_v45, 4 }
 0x149   : > { %v4560_v6 = vpop.f32.mrf.mxu0  ;;  %v1630_v0 = vsel %vm1605_vm4, %v1627_v57, %v1629_v48  ;;  %v1004_v48 = vrot.slane %v4482_v56, 1 }
 0x14b   : > { %1696 = vrot.lane.b32.xlu1 %v1620_v7, %s4153_s9  ;;  %1487 = vrot.lane.b32.xlu0 %v1411_v63, %s4152_s21  ;;  %v4568_v11 = vpop.f32.mrf.mxu0  ;;  %v1002_v63 = vrot.slane %v4452_v29, 1  ;;  %v1421_v29 = vsel %vm1396_vm3, %v1418_v58, %v1420_v42  ;;  %v1213_v42 = vrot.slane %v4482_v56, 2 }
 0x14d   : > { %v3753_v16 = vpop.f32.mrf.mxu0 }
 0x14e   : > { %v1209_v16 = vrot.slane %v4471_v45, 2 }
 0x14f   : > { %1694 = vrot.lane.b32.xlu1 %v1618_v17, %s4153_s9  ;;  %1485 = vrot.lane.b32.xlu0 %v1409_v21, %s4152_s21  ;;  %v4578_v28 = vpop.f32.mrf.mxu0  ;;  %v1000_v17 = vrot.slane %v4471_v45, 1 }
 0x150   : > { %v1212_v24 = vsel %vm1187_vm1, %v1209_v16, %v1211_v8 }
 0x151   : > { %v4580_v31 = vpop.f32.mrf.mxu0 }
 0x153   : > { %1282 = vrot.lane.b32.xlu1 %v1207_v32, %s4150_s12  ;;  %1073 = vrot.lane.b32.xlu0 %v998_v33, %s4151_s19  ;;  %v4588_v39 = vpop.f32.mrf.mxu0  ;;  %v1003_v32 = vsel %vm978_vm2, %v1000_v17, %v1002_v63  ;;  %v1208_v33 = vrot.slane %v4462_v34, 2  ;;  %v1417_v63 = vrot.slane %v4462_v34, 3 }
 0x155   : > { %v3757_v50 = vpop.f32.mrf.mxu0 }
 0x157   : > { %1280 = vrot.lane.b32.xlu1 %v1205_v53, %s4150_s12  ;;  %1071 = vrot.lane.b32.xlu0 %v996_v54, %s4151_s19  ;;  %v4598_v59 = vpop.f32.mrf.mxu0  ;;  %v1210_v53 = vsel %vm1187_vm1, %v1208_v33, %v1209_v16  ;;  %v1001_v54 = vsel %vm978_vm2, %v999_v35, %v1000_v17  ;;  %v1628_v16 = vsel %vm1605_vm4, %v1626_v46, %v1627_v57 }
 0x158   : > { %v1419_v17 = vsel %vm1396_vm3, %v1417_v63, %v1418_v58  ;;  %v1632_v58 = vrot.slane %v4493_v3, 4 }
 0x159   : > { %v4600_v61 = vpop.f32.mrf.mxu0 }
 0x15b   : > { %1700 = vrot.lane.b32.xlu1 %v1625_v62, %s4153_s9  ;;  %1491 = vrot.lane.b32.xlu0 %v1416_v13, %s4152_s21  ;;  %v4608_v7 = vpop.f32.mrf.mxu0 }
 0x15d   : > { %v3761_v10 = vpop.f32.mrf.mxu0 }
 0x15e   : > { %v1007_v10 = vrot.slane %v4474_v49, 1 }
 0x15f   : > { %1698 = vrot.lane.b32.xlu1 %v1623_v14, %s4153_s9  ;;  %1489 = vrot.lane.b32.xlu0 %v1414_v15, %s4152_s21  ;;  %v4618_v21 = vpop.f32.mrf.mxu0  ;;  %v1216_v14 = vrot.slane %v4474_v49, 2 }
 0x161   : > { %v4620_v23 = vpop.f32.mrf.mxu0 }
 0x163   : > { %1286 = vrot.lane.b32.xlu1 %v1212_v24, %s4150_s12  ;;  %1077 = vrot.lane.b32.xlu0 %v1003_v32, %s4151_s19  ;;  %v4628_v38 = vpop.f32.mrf.mxu0  ;;  %v1214_v24 = vrot.slane %v4493_v3, 2  ;;  %v1005_v32 = vrot.slane %v4493_v3, 1 }
 0x165   : > { %v3765_v50 = vpop.f32.mrf.mxu0  ;;  %v1217_v33 = vsel %vm1187_vm1, %v1214_v24, %v1216_v14  ;;  %v1008_v35 = vsel %vm978_vm2, %v1005_v32, %v1007_v10  ;;  %v1006_v57 = vsel %vm978_vm2, %v1004_v48, %v1005_v32  ;;  %v1012_v10 = vrot.slane %v4498_v4, 1 }
 0x166   : > { %v1425_v50 = vrot.slane %v4474_v49, 3  ;;  %v1221_v14 = vrot.slane %v4498_v4, 2 }
 0x167   : > { %1284 = vrot.lane.b32.xlu1 %v1210_v53, %s4150_s12  ;;  %1075 = vrot.lane.b32.xlu0 %v1001_v54, %s4151_s19  ;;  %v4638_v62 = vpop.f32.mrf.mxu0  ;;  %v1634_v53 = vrot.slane %v4474_v49, 4  ;;  %v1215_v54 = vsel %vm1187_vm1, %v1213_v42, %v1214_v24  ;;  %v1422_v49 = vrot.slane %v4482_v56, 3 }
 0x169   : > { %v4640_v13 = vpop.f32.mrf.mxu0  ;;  %v1635_v46 = vsel %vm1605_vm4, %v1632_v58, %v1634_v53 }
 0x16b   : > { %1704 = vrot.lane.b32.xlu1 %v1630_v0, %s4153_s9  ;;  %1495 = vrot.lane.b32.xlu0 %v1421_v29, %s4152_s21  ;;  %v4648_v8 = vpop.f32.mrf.mxu0  ;;  %v1423_v0 = vrot.slane %v4493_v3, 3  ;;  %v1631_v29 = vrot.slane %v4482_v56, 4 }
 0x16d   : > { %v3769_v15 = vpop.f32.mrf.mxu0  ;;  %v1426_v63 = vsel %vm1396_vm3, %v1423_v0, %v1425_v50  ;;  %v1424_v32 = vsel %vm1396_vm3, %v1422_v49, %v1423_v0  ;;  %v1430_v0 = vrot.slane %v4498_v4, 3 }
 0x16f   : > { %1702 = vrot.lane.b32.xlu1 %v1628_v16, %s4153_s9  ;;  %1493 = vrot.lane.b32.xlu0 %v1419_v17, %s4152_s21  ;;  %v1633_v17 = vsel %vm1605_vm4, %v1631_v29, %v1632_v58  ;;  %v1639_v29 = vrot.slane %v4498_v4, 4 }
 0x173   : > { %1290 = vrot.lane.b32.xlu1 %v1217_v33, %s4150_s12  ;;  %1081 = vrot.lane.b32.xlu0 %v1008_v35, %s4151_s19  ;;  %v1219_v33 = vrot.slane %v4515_v20, 2  ;;  %v1010_v35 = vrot.slane %v4515_v20, 1 }
 0x175   : > { %v1222_v53 = vsel %vm1187_vm1, %v1219_v33, %v1221_v14  ;;  %v1428_v14 = vrot.slane %v4515_v20, 3 }
 0x177   : > { %1288 = vrot.lane.b32.xlu1 %v1215_v54, %s4150_s12  ;;  %1079 = vrot.lane.b32.xlu0 %v1006_v57, %s4151_s19  ;;  %v1013_v54 = vsel %vm978_vm2, %v1010_v35, %v1012_v10  ;;  %v1218_v57 = vrot.slane %v4506_v9, 2  ;;  %v1637_v10 = vrot.slane %v4515_v20, 4 }
 0x17b   : > { %1708 = vrot.lane.b32.xlu1 %v1635_v46, %s4153_s9  ;;  %1499 = vrot.lane.b32.xlu0 %v1426_v63, %s4152_s21  ;;  %v4699_v46 = vld [vmem:[%s5321_s3] ss:$0 sm:$0xff] }
 0x17d   : > { %v1271_v15 = vpop.permute.xlu1 %1270  ;;  %v1062_v16 = vpop.permute.xlu0 %1061 }
 0x17e   : > { %v1156_v24 = vadd.f32 %v1062_v16, %v4382_v40  ;;  %v1009_v40 = vrot.slane %v4506_v9, 1 }
 0x17f   : > { %1706 = vrot.lane.b32.xlu1 %v1633_v17, %s4153_s9  ;;  %1497 = vrot.lane.b32.xlu0 %v1424_v32, %s4152_s21  ;;  %v1220_v17 = vsel %vm1187_vm1, %v1218_v57, %v1219_v33  ;;  %v1640_v33 = vsel %vm1605_vm4, %v1637_v10, %v1639_v29 }
 0x180   : > { %v1365_v42 = vadd.f32 %v1271_v15, %v1156_v24  ;;  %v1011_v24 = vsel %vm978_vm2, %v1009_v40, %v1010_v35  ;;  %v1431_v35 = vsel %vm1396_vm3, %v1428_v14, %v1430_v0  ;;  %v1017_v40 = vrot.slane %v4518_v22, 1 }
 0x181   : > { %v1480_v48 = vpop.permute.xlu1 %1479  ;;  %v1060_v50 = vpop.permute.xlu0 %1059 }
 0x182   : > { %v1574_v58 = vadd.f32 %v1480_v48, %v1365_v42  ;;  %v1155_v15 = vadd.f32 %v1060_v50, %v4378_v36 }
 0x183   : > { %1294 = vrot.lane.b32.xlu1 %v1222_v53, %s4150_s12  ;;  %1085 = vrot.lane.b32.xlu0 %v1013_v54, %s4151_s19  ;;  %v1636_v53 = vrot.slane %v4506_v9, 4  ;;  %v1427_v54 = vrot.slane %v4506_v9, 3 }
 0x185   : > { %v1689_v63 = vpop.permute.xlu1 %1688  ;;  %v1269_v49 = vpop.permute.xlu0 %1268  ;;  %v1429_v29 = vsel %vm1396_vm3, %v1427_v54, %v1428_v14  ;;  %v4739_v14 = vld [vmem:[%s4730_s20] sm:$0x1]  ;;  %v1435_v54 = vrot.slane %v4518_v22, 3 }
 0x186   : > { %v1783_v16 = vadd.f32 %v1689_v63, %v1574_v58  ;;  %v1364_v32 = vadd.f32 %v1269_v49, %v1155_v15  ;;  %v1226_v58 = vrot.slane %v4518_v22, 2  ;;  %v1638_v15 = vsel %vm1605_vm4, %v1636_v53, %v1637_v10 }
 0x187   : > { %1292 = vrot.lane.b32.xlu1 %v1220_v17, %s4150_s12  ;;  %1083 = vrot.lane.b32.xlu0 %v1011_v24, %s4151_s19  ;;  %v1015_v17 = vrot.slane %v4538_v43, 1  ;;  %v1014_v53 = vrot.slane %v4526_v30, 1 }
 0x188   : > { %v1822_v4 = vadd.f32 %v4699_v46, %v1783_v16  ;;  %v1224_v16 = vrot.slane %v4538_v43, 2 }
 0x189   : > { %v1687_v42 = vpop.permute.xlu1 %1686  ;;  %v1478_v48 = vpop.permute.xlu0 %1477 }
 0x18a   : > { %v1854_v36 = vmax.f32 %v1822_v4, 0.0  ;;  %v1573_v50 = vadd.f32 %v1478_v48, %v1364_v32  ;;  %v1227_v32 = vsel %vm1187_vm1, %v1224_v16, %v1226_v58  ;;  %v1223_v48 = vrot.slane %v4526_v30, 2 }
 0x18b   : > { %1712 = vrot.lane.b32.xlu1 %v1640_v33, %s4153_s9  ;;  %1503 = vrot.lane.b32.xlu0 %v1431_v35, %s4152_s21  ;;  %v1433_v58 = vrot.slane %v4538_v43, 3 }
 0x18c   : > { %v1782_v57 = vadd.f32 %v1687_v42, %v1573_v50  ;;  %3779 = vmatpush3.msra.mxu1 %v1854_v36  ;;  %v1018_v42 = vsel %vm978_vm2, %v1015_v17, %v1017_v40  ;;  %v1644_v36 = vrot.slane %v4518_v22, 4  ;;  %v1225_v35 = vsel %vm1187_vm1, %v1223_v48, %v1224_v16 }
 0x18d   : > { %v4717_v63 = vpop.permute.xlu1 %1326  ;;  %v4719_v49 = vpop.permute.xlu0 %1117  ;;  %3780 = vmatprep.subr.mxu1 %v5330_v18  ;;  %v1642_v40 = vrot.slane %v4538_v43, 4  ;;  %v1432_v16 = vrot.slane %v4526_v30, 3 }
 0x18e   : > { %v1821_v0 = vadd.f32 %v4699_v46, %v1782_v57  ;;  %v1016_v57 = vsel %vm978_vm2, %v1014_v53, %v1015_v17  ;;  %v1022_v17 = vrot.slane %v4540_v44, 1 }
 0x18f   : > { %1710 = vrot.lane.b32.xlu1 %v1638_v15, %s4153_s9  ;;  %1501 = vrot.lane.b32.xlu0 %v1429_v29, %s4152_s21  ;;  %v1436_v29 = vsel %vm1396_vm3, %v1433_v58, %v1435_v54  ;;  %v1229_v54 = vrot.slane %v4558_v5, 2 }
 0x190   : > { %v1853_v10 = vmax.f32 %v1821_v0, 0.0  ;;  %v1645_v0 = vsel %vm1605_vm4, %v1642_v40, %v1644_v36  ;;  %v1434_v36 = vsel %vm1396_vm3, %v1432_v16, %v1433_v58  ;;  %v1019_v58 = vrot.slane %v4548_v55, 1 }
 0x191   : > { %v4734_v24 = vpop.permute.xlu1 %1324  ;;  %v4736_v4 = vpop.permute.xlu0 %1115 }
 0x192   : > { %3781 = vmatpush3.msra.mxu1 %v1853_v10  ;;  %v1641_v10 = vrot.slane %v4526_v30, 4 }
 0x193   : > { %1298 = vrot.lane.b32.xlu1 %v1227_v32, %s4150_s12  ;;  %1089 = vrot.lane.b32.xlu0 %v1018_v42, %s4151_s19  ;;  %v1231_v32 = vrot.slane %v4540_v44, 2 }
 0x194   : > { %3785 = vmatprep.subr.mxu1 %v5330_v18  ;;  %3783 = vmatmul.mubr.msk.f32.vlgmr.msra.gmra.mxu1 %vm1901_vm6, %v4739_v14  ;;  %v1643_v53 = vsel %vm1605_vm4, %v1641_v10, %v1642_v40 }
 0x195   : > { %v4752_v50 = vpop.permute.xlu1 %1744  ;;  %v4754_v33 = vpop.permute.xlu0 %1535  ;;  %3789 = vmatprep.mubr.msk.f32.mxu1 %vm4155_vm5, %v5330_v18  ;;  %v1232_v18 = vsel %vm1187_vm1, %v1229_v54, %v1231_v32  ;;  %v1438_v32 = vrot.slane %v4558_v5, 3 }
 0x197   : > { %1296 = vrot.lane.b32.xlu1 %v1225_v35, %s4150_s12  ;;  %1087 = vrot.lane.b32.xlu0 %v1016_v57, %s4151_s19  ;;  %v1020_v35 = vrot.slane %v4558_v5, 1 }
 0x199   : > { %v4764_v22 = vpop.permute.xlu0 %1533  ;;  %v1066_v15 = vpop.permute.xlu1 %1065  ;;  %v1023_v40 = vsel %vm978_vm2, %v1020_v35, %v1022_v17 }
 0x19a   : > { %5338 = vst [vmem:[#allocation8_spill] sm:$0xff] %v4764_v22  ;;  %v1158_v57 = vadd.f32 %v1066_v15, %v4407_v60  ;;  %v1440_v60 = vrot.slane %v4540_v44, 3  ;;  %v1649_v15 = vrot.slane %v4540_v44, 4  ;;  %v1230_v22 = vsel %vm1187_vm1, %v1228_v25, %v1229_v54 }
 0x19b   : > { %1716 = vrot.lane.b32.xlu1 %v1645_v0, %s4153_s9  ;;  %1507 = vrot.lane.b32.xlu0 %v1436_v29, %s4152_s21 }
 0x19c   : > { %v1441_v54 = vsel %vm1396_vm3, %v1438_v32, %v1440_v60 }
 0x19d   : > { %v1275_v42 = vpop.permute.xlu1 %1274  ;;  %v1064_v48 = vpop.permute.xlu0 %1063 }
 0x19e   : > { %v1367_v26 = vadd.f32 %v1275_v42, %v1158_v57  ;;  %v1157_v10 = vadd.f32 %v1064_v48, %v4397_v51  ;;  %v1647_v42 = vrot.slane %v4558_v5, 4 }
 0x19f   : > { %1714 = vrot.lane.b32.xlu1 %v1643_v53, %s4153_s9  ;;  %1505 = vrot.lane.b32.xlu0 %v1434_v36, %s4152_s21 }
 0x1a0   : > { %v1650_v25 = vsel %vm1605_vm4, %v1647_v42, %v1649_v15 }
 0x1a1   : > { %v1273_v0 = vpop.permute.xlu1 %1272  ;;  %v1484_v29 = vpop.permute.xlu0 %1483 }
 0x1a2   : > { %v1576_v16 = vadd.f32 %v1484_v29, %v1367_v26  ;;  %v1366_v17 = vadd.f32 %v1273_v0, %v1157_v10  ;;  %v1646_v29 = vrot.slane %v4548_v55, 4 }
 0x1a3   : > { %1302 = vrot.lane.b32.xlu1 %v1232_v18, %s4150_s12  ;;  %1093 = vrot.lane.b32.xlu0 %v1023_v40, %s4151_s19  ;;  %v1021_v18 = vsel %vm978_vm2, %v1019_v58, %v1020_v35  ;;  %v1437_v40 = vrot.slane %v4548_v55, 3  ;;  %v1027_v35 = vrot.slane %v4560_v6, 1  ;;  %v1236_v58 = vrot.slane %v4560_v6, 2 }
 0x1a4   : > { %v1648_v15 = vsel %vm1605_vm4, %v1646_v29, %v1647_v42  ;;  %v1233_v29 = vrot.slane %v4568_v11, 2 }
 0x1a5   : > { %v1693_v53 = vpop.permute.xlu1 %1692  ;;  %v1482_v36 = vpop.permute.xlu0 %1481 }
 0x1a6   : > { %v1785_v57 = vadd.f32 %v1693_v53, %v1576_v16  ;;  %v1575_v26 = vadd.f32 %v1482_v36, %v1366_v17  ;;  %v5340_v36 = vmov 0.0   ;;  %v1439_v17 = vsel %vm1396_vm3, %v1437_v40, %v1438_v32 }
 0x1a7   : > { %1300 = vrot.lane.b32.xlu1 %v1230_v22, %s4150_s12  ;;  %1091 = vrot.lane.b32.xlu0 %v1021_v18, %s4151_s19  ;;  %v1025_v18 = vrot.slane %v4578_v28, 1  ;;  %v1024_v40 = vrot.slane %v4568_v11, 1 }
 0x1a8   : > { %v1824_v51 = vadd.f32 %v4699_v46, %v1785_v57  ;;  %v1234_v57 = vrot.slane %v4578_v28, 2 }
 0x1a9   : > { %v1691_v44 = vpop.permute.xlu1 %1690  ;;  %v4797_v48 = vpop.permute.xlu0 %1121  ;;  %v1028_v32 = vsel %vm978_vm2, %v1025_v18, %v1027_v35  ;;  %v1026_v35 = vsel %vm978_vm2, %v1024_v40, %v1025_v18  ;;  %v1442_v18 = vrot.slane %v4568_v11, 3 }
 0x1aa   : > { %v1856_v0 = vmax.f32 %v1824_v51, 0.0  ;;  %v1784_v10 = vadd.f32 %v1691_v44, %v1575_v26  ;;  %v4818_v51 = vld [vmem:[%s4730_s20 + $0x1] sm:$0x1]  ;;  %v1237_v42 = vsel %vm1187_vm1, %v1234_v57, %v1236_v58  ;;  %v1652_v58 = vrot.slane %v4578_v28, 4 }
 0x1ab   : > { %1720 = vrot.lane.b32.xlu1 %v1650_v25, %s4153_s9  ;;  %1511 = vrot.lane.b32.xlu0 %v1441_v54, %s4152_s21 }
 0x1ac   : > { %v1823_v22 = vadd.f32 %v4699_v46, %v1784_v10  ;;  %3786 = vmatpush3.msra.mxu1 %v1856_v0  ;;  %v1445_v0 = vrot.slane %v4560_v6, 3  ;;  %v1654_v10 = vrot.slane %v4560_v6, 4  ;;  %v1651_v6 = vrot.slane %v4568_v11, 4 }
 0x1ad   : > { %v4808_v16 = vpop.permute.xlu1 %1330  ;;  %v4810_v53 = vpop.permute.xlu0 %1119  ;;  %3787 = vmatprep.subr.mxu1 %v5340_v36 }
 0x1ae   : > { %5339 = vst [vmem:[#allocation9_spill] sm:$0xff] %v4808_v16  ;;  %v1855_v60 = vmax.f32 %v1823_v22, 0.0  ;;  %v1235_v22 = vsel %vm1187_vm1, %v1233_v29, %v1234_v57  ;;  %v1029_v16 = vrot.slane %v4588_v39, 1 }
 0x1af   : > { %1718 = vrot.lane.b32.xlu1 %v1648_v15, %s4153_s9  ;;  %1509 = vrot.lane.b32.xlu0 %v1439_v17, %s4152_s21  ;;  %v1443_v15 = vrot.slane %v4578_v28, 3 }
 0x1b0   : > { %3788 = vmatpush3.msra.mxu1 %v1855_v60 }
 0x1b1   : > { %v4822_v26 = vpop.permute.xlu1 %1539  ;;  %v4824_v44 = vpop.permute.xlu0 %1328  ;;  %3792 = vmatprep.subr.mxu1 %v5340_v36  ;;  %3790 = vmatmul.mubr.msk.f32.vlgmr.msra.gmra.mxu1 %vm1901_vm6, %v4818_v51  ;;  %v1446_v57 = vsel %vm1396_vm3, %v1443_v15, %v1445_v0  ;;  %v1444_v0 = vsel %vm1396_vm3, %v1442_v18, %v1443_v15 }
 0x1b2   : > { %5341 = vst [vmem:[#allocation10_spill] sm:$0xff] %v4822_v26  ;;  %5342 = vst [vmem:[#allocation11_spill] sm:$0xff] %v4824_v44  ;;  %3796 = vmatprep.mubr.msk.f32.mxu1 %vm4155_vm5, %v5340_v36  ;;  %v1653_v26 = vsel %vm1605_vm4, %v1651_v6, %v1652_v58  ;;  %v1239_v44 = vrot.slane %v4598_v59, 2 }
 0x1b3   : > { %1306 = vrot.lane.b32.xlu1 %v1237_v42, %s4150_s12  ;;  %1097 = vrot.lane.b32.xlu0 %v1028_v32, %s4151_s19  ;;  %v1655_v32 = vsel %vm1605_vm4, %v1652_v58, %v1654_v10 }
 0x1b5   : > { %v1279_v25 = vpop.permute.xlu1 %1278  ;;  %v1070_v54 = vpop.permute.xlu0 %1069 }
 0x1b6   : > { %v1160_v60 = vadd.f32 %v1070_v54, %v4428_v12  ;;  %v1241_v12 = vrot.slane %v4580_v31, 2 }
 0x1b7   : > { %1304 = vrot.lane.b32.xlu1 %v1235_v22, %s4150_s12  ;;  %1095 = vrot.lane.b32.xlu0 %v1026_v35, %s4151_s19  ;;  %v1032_v22 = vrot.slane %v4580_v31, 1 }
 0x1b8   : > { %v1369_v40 = vadd.f32 %v1279_v25, %v1160_v60  ;;  %v1242_v15 = vsel %vm1187_vm1, %v1239_v44, %v1241_v12 }
 0x1b9   : > { %v1277_v17 = vpop.permute.xlu1 %1276  ;;  %v1068_v42 = vpop.permute.xlu0 %1067 }
 0x1ba   : > { %v1159_v29 = vadd.f32 %v1068_v42, %v4416_v2 }
 0x1bb   : > { %1724 = vrot.lane.b32.xlu1 %v1655_v32, %s4153_s9  ;;  %1515 = vrot.lane.b32.xlu0 %v1446_v57, %s4152_s21  ;;  %v1030_v32 = vrot.slane %v4598_v59, 1  ;;  %v1238_v57 = vrot.slane %v4588_v39, 2 }
 0x1bc   : > { %v1368_v25 = vadd.f32 %v1277_v17, %v1159_v29  ;;  %v1450_v17 = vrot.slane %v4580_v31, 3  ;;  %v1659_v29 = vrot.slane %v4580_v31, 4 }
 0x1bd   : > { %v1697_v54 = vpop.permute.xlu1 %1696  ;;  %v1488_v35 = vpop.permute.xlu0 %1487  ;;  %v1033_v18 = vsel %vm978_vm2, %v1030_v32, %v1032_v22  ;;  %v1240_v22 = vsel %vm1187_vm1, %v1238_v57, %v1239_v44  ;;  %v1031_v12 = vsel %vm978_vm2, %v1029_v16, %v1030_v32  ;;  %v1447_v32 = vrot.slane %v4588_v39, 3 }
 0x1be   : > { %v1578_v10 = vadd.f32 %v1488_v35, %v1369_v40 }
 0x1bf   : > { %1722 = vrot.lane.b32.xlu1 %v1653_v26, %s4153_s9  ;;  %1513 = vrot.lane.b32.xlu0 %v1444_v0, %s4152_s21 }
 0x1c0   : > { %v1787_v2 = vadd.f32 %v1697_v54, %v1578_v10  ;;  %v1657_v10 = vrot.slane %v4598_v59, 4 }
 0x1c1   : > { %v1695_v60 = vpop.permute.xlu1 %1694  ;;  %v1486_v42 = vpop.permute.xlu0 %1485 }
 0x1c2   : > { %v1826_v58 = vadd.f32 %v4699_v46, %v1787_v2  ;;  %v1577_v6 = vadd.f32 %v1486_v42, %v1368_v25  ;;  %v1448_v2 = vrot.slane %v4598_v59, 3  ;;  %v1660_v16 = vsel %vm1605_vm4, %v1657_v10, %v1659_v29 }
 0x1c3   : > { %1310 = vrot.lane.b32.xlu1 %v1242_v15, %s4150_s12  ;;  %1101 = vrot.lane.b32.xlu0 %v1033_v18, %s4151_s19  ;;  %v1037_v15 = vrot.slane %v4600_v61, 1  ;;  %v1246_v18 = vrot.slane %v4600_v61, 2 }
 0x1c4   : > { %v1858_v26 = vmax.f32 %v1826_v58, 0.0  ;;  %v1786_v40 = vadd.f32 %v1695_v60, %v1577_v6  ;;  %v1656_v58 = vrot.slane %v4588_v39, 4  ;;  %v4881_v6 = vld [vmem:[%s4730_s20 + $0x2] sm:$0x1]  ;;  %v1451_v44 = vsel %vm1396_vm3, %v1448_v2, %v1450_v17 }
 0x1c5   : > { %v1283_v54 = vpop.permute.xlu1 %1282  ;;  %v1074_v35 = vpop.permute.xlu0 %1073 }
 0x1c6   : > { %v1825_v0 = vadd.f32 %v4699_v46, %v1786_v40  ;;  %3793 = vmatpush3.msra.mxu1 %v1858_v26  ;;  %v1162_v31 = vadd.f32 %v1074_v35, %v4449_v27  ;;  %v1658_v17 = vsel %vm1605_vm4, %v1656_v58, %v1657_v10  ;;  %v1035_v35 = vrot.slane %v4618_v21, 1 }
 0x1c7   : > { %1308 = vrot.lane.b32.xlu1 %v1240_v22, %s4150_s12  ;;  %1099 = vrot.lane.b32.xlu0 %v1031_v12, %s4151_s19  ;;  %v1243_v10 = vrot.slane %v4608_v7, 2 }
 0x1c8   : > { %v1857_v25 = vmax.f32 %v1825_v0, 0.0  ;;  %3794 = vmatprep.subr.mxu1 %v5340_v36  ;;  %v1371_v57 = vadd.f32 %v1283_v54, %v1162_v31  ;;  %v1244_v54 = vrot.slane %v4618_v21, 2  ;;  %v1034_v31 = vrot.slane %v4608_v7, 1 }
 0x1c9   : > { %v1281_v60 = vpop.permute.xlu1 %1280  ;;  %v1072_v42 = vpop.permute.xlu0 %1071 }
 0x1ca   : > { %3795 = vmatpush3.msra.mxu1 %v1857_v25  ;;  %v1161_v27 = vadd.f32 %v1072_v42, %v4439_v19  ;;  %v1449_v19 = vsel %vm1396_vm3, %v1447_v32, %v1448_v2  ;;  %v1247_v2 = vsel %vm1187_vm1, %v1244_v54, %v1246_v18  ;;  %v1036_v18 = vsel %vm978_vm2, %v1034_v31, %v1035_v35 }
 0x1cb   : > { %1728 = vrot.lane.b32.xlu1 %v1660_v16, %s4153_s9  ;;  %1519 = vrot.lane.b32.xlu0 %v1451_v44, %s4152_s21  ;;  %v1038_v16 = vsel %vm978_vm2, %v1035_v35, %v1037_v15  ;;  %v1245_v15 = vsel %vm1187_vm1, %v1243_v10, %v1244_v54  ;;  %v1452_v10 = vrot.slane %v4608_v7, 3 }
 0x1cc   : > { %3799 = vmatprep.subr.mxu1 %v5340_v36  ;;  %3797 = vmatmul.mubr.msk.f32.vlgmr.msra.gmra.mxu1 %vm1901_vm6, %v4881_v6  ;;  %v1370_v22 = vadd.f32 %v1281_v60, %v1161_v27  ;;  %v1455_v60 = vrot.slane %v4600_v61, 3  ;;  %v1664_v27 = vrot.slane %v4600_v61, 4 }
 0x1cd   : > { %v1701_v26 = vpop.permute.xlu1 %1700  ;;  %v1492_v40 = vpop.permute.xlu0 %1491  ;;  %3803 = vmatprep.mubr.msk.f32.mxu1 %vm4155_vm5, %v5340_v36 }
 0x1ce   : > { %v1580_v29 = vadd.f32 %v1492_v40, %v1371_v57  ;;  %v1662_v40 = vrot.slane %v4618_v21, 4 }
 0x1cf   : > { %1726 = vrot.lane.b32.xlu1 %v1658_v17, %s4153_s9  ;;  %1517 = vrot.lane.b32.xlu0 %v1449_v19, %s4152_s21 }
 0x1d0   : > { %v1789_v0 = vadd.f32 %v1701_v26, %v1580_v29  ;;  %v1453_v29 = vrot.slane %v4618_v21, 3  ;;  %v1665_v54 = vsel %vm1605_vm4, %v1662_v40, %v1664_v27  ;;  %v1040_v27 = vrot.slane %v4638_v62, 1 }
 0x1d1   : > { %v1699_v12 = vpop.permute.xlu1 %1698  ;;  %v1490_v25 = vpop.permute.xlu0 %1489 }
 0x1d2   : > { %v1828_v42 = vadd.f32 %v4699_v46, %v1789_v0  ;;  %v1579_v58 = vadd.f32 %v1490_v25, %v1370_v22  ;;  %v4922_v25 = vld [vmem:[%s4730_s20 + $0x3] sm:$0x1]  ;;  %v1456_v35 = vsel %vm1396_vm3, %v1453_v29, %v1455_v60  ;;  %v1249_v60 = vrot.slane %v4638_v62, 2 }
 0x1d3   : > { %1314 = vrot.lane.b32.xlu1 %v1247_v2, %s4150_s12  ;;  %1105 = vrot.lane.b32.xlu0 %v1038_v16, %s4151_s19 }
 0x1d4   : > { %v1860_v44 = vmax.f32 %v1828_v42, 0.0  ;;  %v1788_v32 = vadd.f32 %v1699_v12, %v1579_v58  ;;  %v1661_v12 = vrot.slane %v4608_v7, 4  ;;  %v1042_v42 = vrot.slane %v4620_v23, 1 }
 0x1d5   : > { %v1287_v57 = vpop.permute.xlu1 %1286  ;;  %v1078_v26 = vpop.permute.xlu0 %1077  ;;  %v1251_v58 = vrot.slane %v4620_v23, 2 }
 0x1d6   : > { %v1827_v17 = vadd.f32 %v4699_v46, %v1788_v32  ;;  %3800 = vmatpush3.msra.mxu1 %v1860_v44  ;;  %v1164_v61 = vadd.f32 %v1078_v26, %v4471_v45  ;;  %v1663_v44 = vsel %vm1605_vm4, %v1661_v12, %v1662_v40  ;;  %v1248_v40 = vrot.slane %v4628_v38, 2 }
 0x1d7   : > { %1312 = vrot.lane.b32.xlu1 %v1245_v15, %s4150_s12  ;;  %1103 = vrot.lane.b32.xlu0 %v1036_v18, %s4151_s19  ;;  %v1039_v18 = vrot.slane %v4628_v38, 1 }
 0x1d8   : > { %v1859_v19 = vmax.f32 %v1827_v17, 0.0  ;;  %3801 = vmatprep.subr.mxu1 %v5340_v36  ;;  %v1373_v31 = vadd.f32 %v1287_v57, %v1164_v61 }
 0x1d9   : > { %v1285_v0 = vpop.permute.xlu1 %1284  ;;  %v1076_v22 = vpop.permute.xlu0 %1075 }
 0x1da   : > { %3802 = vmatpush3.msra.mxu1 %v1859_v19  ;;  %v1163_v45 = vadd.f32 %v1076_v22, %v4462_v34  ;;  %v1454_v34 = vsel %vm1396_vm3, %v1452_v10, %v1453_v29  ;;  %v1252_v29 = vsel %vm1187_vm1, %v1249_v60, %v1251_v58  ;;  %v1043_v22 = vsel %vm978_vm2, %v1040_v27, %v1042_v42 }
 0x1db   : > { %1732 = vrot.lane.b32.xlu1 %v1665_v54, %s4153_s9  ;;  %1523 = vrot.lane.b32.xlu0 %v1456_v35, %s4152_s21  ;;  %v1669_v35 = vrot.slane %v4620_v23, 4  ;;  %v1250_v42 = vsel %vm1187_vm1, %v1248_v40, %v1249_v60  ;;  %v1041_v58 = vsel %vm978_vm2, %v1039_v18, %v1040_v27  ;;  %v1047_v18 = vrot.slane %v4640_v13, 1 }
 0x1dc   : > { %3806 = vmatprep.subr.mxu1 %v5340_v36  ;;  %3804 = vmatmul.mubr.msk.f32.vlgmr.msra.gmra.mxu1 %vm1901_vm6, %v4922_v25  ;;  %v1372_v26 = vadd.f32 %v1285_v0, %v1163_v45  ;;  %v1460_v0 = vrot.slane %v4620_v23, 3 }
 0x1dd   : > { %v1705_v2 = vpop.permute.xlu1 %1704  ;;  %v1496_v16 = vpop.permute.xlu0 %1495  ;;  %3810 = vmatprep.mubr.msk.f32.mxu1 %vm4155_vm5, %v5340_v36 }
 0x1de   : > { %v1582_v32 = vadd.f32 %v1496_v16, %v1373_v31  ;;  %v1667_v31 = vrot.slane %v4638_v62, 4  ;;  %v1458_v16 = vrot.slane %v4638_v62, 3 }
 0x1df   : > { %1730 = vrot.lane.b32.xlu1 %v1663_v44, %s4153_s9  ;;  %1521 = vrot.lane.b32.xlu0 %v1454_v34, %s4152_s21 }
 0x1e0   : > { %v1791_v57 = vadd.f32 %v1705_v2, %v1582_v32  ;;  %v1670_v60 = vsel %vm1605_vm4, %v1667_v31, %v1669_v35  ;;  %v1461_v27 = vsel %vm1396_vm3, %v1458_v16, %v1460_v0 }
 0x1e1   : > { %v1703_v17 = vpop.permute.xlu1 %1702  ;;  %v1494_v15 = vpop.permute.xlu0 %1493 }
 0x1e2   : > { %v1830_v19 = vadd.f32 %v4699_v46, %v1791_v57  ;;  %v1581_v61 = vadd.f32 %v1494_v15, %v1372_v26  ;;  %v1666_v57 = vrot.slane %v4628_v38, 4  ;;  %v4963_v26 = vld [vmem:[%s4730_s20 + $0x4] sm:$0x1]  ;;  %v4968_v15 = vpop.f32.mrf.mxu0 }
 0x1e3   : > { %1318 = vrot.lane.b32.xlu1 %v1252_v29, %s4150_s12  ;;  %1109 = vrot.lane.b32.xlu0 %v1043_v22, %s4151_s19 }
 0x1e4   : > { %v1862_v12 = vmax.f32 %v1830_v19, 0.0  ;;  %v1790_v54 = vadd.f32 %v1703_v17, %v1581_v61  ;;  %v1457_v17 = vrot.slane %v4628_v38, 3  ;;  %v1256_v19 = vrot.slane %v4640_v13, 2 }
 0x1e5   : > { %v1291_v10 = vpop.permute.xlu1 %1290  ;;  %v1082_v45 = vpop.permute.xlu0 %1081  ;;  %v1668_v22 = vsel %vm1605_vm4, %v1666_v57, %v1667_v31  ;;  %v1253_v31 = vrot.slane %v4648_v8, 2 }
 0x1e6   : > { %v1829_v2 = vadd.f32 %v4699_v46, %v1790_v54  ;;  %3807 = vmatpush3.msra.mxu1 %v1862_v12  ;;  %v1166_v23 = vadd.f32 %v1082_v45, %v4493_v3  ;;  %v1045_v12 = vrot.slane %v4968_v15, 1  ;;  %v1459_v0 = vsel %vm1396_vm3, %v1457_v17, %v1458_v16 }
 0x1e7   : > { %1316 = vrot.lane.b32.xlu1 %v1250_v42, %s4150_s12  ;;  %1107 = vrot.lane.b32.xlu0 %v1041_v58, %s4151_s19  ;;  %v1044_v42 = vrot.slane %v4648_v8, 1 }
 0x1e8   : > { %v1861_v44 = vmax.f32 %v1829_v2, 0.0  ;;  %3808 = vmatprep.subr.mxu1 %v5340_v36  ;;  %v1375_v40 = vadd.f32 %v1291_v10, %v1166_v23 }
 0x1e9   : > { %v1289_v32 = vpop.permute.xlu1 %1288  ;;  %v1080_v34 = vpop.permute.xlu0 %1079 }
 0x1ea   : > { %3809 = vmatpush3.msra.mxu1 %v1861_v44  ;;  %v1165_v3 = vadd.f32 %v1080_v34, %v4482_v56  ;;  %v1254_v56 = vrot.slane %v4968_v15, 2  ;;  %v1048_v34 = vsel %vm978_vm2, %v1045_v12, %v1047_v18 }
 0x1eb   : > { %1736 = vrot.lane.b32.xlu1 %v1670_v60, %s4153_s9  ;;  %1527 = vrot.lane.b32.xlu0 %v1461_v27, %s4152_s21  ;;  %v1674_v60 = vrot.slane %v4640_v13, 4  ;;  %v1463_v27 = vrot.slane %v4968_v15, 3 }
 0x1ec   : > { %3813 = vmatprep.subr.mxu1 %v5340_v36  ;;  %3811 = vmatmul.mubr.msk.f32.vlgmr.msra.gmra.mxu1 %vm1901_vm6, %v4963_v26  ;;  %v1374_v10 = vadd.f32 %v1289_v32, %v1165_v3  ;;  %v1257_v23 = vsel %vm1187_vm1, %v1254_v56, %v1256_v19  ;;  %v1465_v32 = vrot.slane %v4640_v13, 3  ;;  %v1255_v18 = vsel %vm1187_vm1, %v1253_v31, %v1254_v56 }
 0x1ed   : > { %v1709_v61 = vpop.permute.xlu1 %1708  ;;  %v1500_v29 = vpop.permute.xlu0 %1499  ;;  %3817 = vmatprep.mubr.msk.f32.mxu1 %vm4155_vm5, %v5340_v36 }
 0x1ee   : > { %v1584_v54 = vadd.f32 %v1500_v29, %v1375_v40  ;;  %v1672_v40 = vrot.slane %v4968_v15, 4  ;;  %v1466_v56 = vsel %vm1396_vm3, %v1463_v27, %v1465_v32 }
 0x1ef   : > { %1734 = vrot.lane.b32.xlu1 %v1668_v22, %s4153_s9  ;;  %1525 = vrot.lane.b32.xlu0 %v1459_v0, %s4152_s21  ;;  %v5005_v0 = vld [vmem:[%s4730_s20 + $0x5] sm:$0x1] }
 0x1f0   : > { %v1793_v35 = vadd.f32 %v1709_v61, %v1584_v54  ;;  %v1046_v61 = vsel %vm978_vm2, %v1044_v42, %v1045_v12  ;;  %v1671_v12 = vrot.slane %v4648_v8, 4  ;;  %v1472_v42 = vrot.slane %v4399_v52, 3 }
 0x1f1   : > { %v1707_v45 = vpop.permute.xlu1 %1706  ;;  %v1498_v2 = vpop.permute.xlu0 %1497 }
 0x1f2   : > { %v1832_v58 = vadd.f32 %v4699_v46, %v1793_v35  ;;  %v1583_v44 = vadd.f32 %v1498_v2, %v1374_v10  ;;  %v1675_v35 = vsel %vm1605_vm4, %v1672_v40, %v1674_v60  ;;  %v1462_v10 = vrot.slane %v4648_v8, 3 }
 0x1f3   : > { %1322 = vrot.lane.b32.xlu1 %v1257_v23, %s4150_s12  ;;  %1113 = vrot.lane.b32.xlu0 %v1048_v34, %s4151_s19  ;;  %v1673_v23 = vsel %vm1605_vm4, %v1671_v12, %v1672_v40 }
 0x1f4   : > { %v1864_v16 = vmax.f32 %v1832_v58, 0.0  ;;  %v1792_v57 = vadd.f32 %v1707_v45, %v1583_v44  ;;  %v1676_v58 = vrot.slane %v4380_v37, 4 }
 0x1f5   : > { %v1295_v17 = vpop.permute.xlu1 %1294  ;;  %v1086_v3 = vpop.permute.xlu0 %1085 }
 0x1f6   : > { %v1831_v19 = vadd.f32 %v4699_v46, %v1792_v57  ;;  %3814 = vmatpush3.msra.mxu1 %v1864_v16  ;;  %v1168_v13 = vadd.f32 %v1086_v3, %v4515_v20  ;;  %v1684_v57 = vrot.slane %v4390_v47, 4 }
 0x1f7   : > { %1320 = vrot.lane.b32.xlu1 %v1255_v18, %s4150_s12  ;;  %1111 = vrot.lane.b32.xlu0 %v1046_v61, %s4151_s19  ;;  %v1681_v61 = vrot.slane %v4399_v52, 4 }
 0x1f8   : > { %v1863_v29 = vmax.f32 %v1831_v19, 0.0  ;;  %3815 = vmatprep.subr.mxu1 %v5340_v36  ;;  %v1377_v45 = vadd.f32 %v1295_v17, %v1168_v13  ;;  %v5343_v17 = vrot.slane %v4489_v1, 3  ;;  %v5344_v19 = vrot.slane %v4384_v41, 4 }
 0x1f9   : > { %v1293_v22 = vpop.permute.xlu1 %1292  ;;  %v1084_v54 = vpop.permute.xlu0 %1083 }
 0x1fa   : > { %3816 = vmatpush3.msra.mxu1 %v1863_v29  ;;  %v1167_v20 = vadd.f32 %v1084_v54, %v4506_v9  ;;  %v1464_v9 = vsel %vm1396_vm3, %v1462_v10, %v1463_v27  ;;  %v1474_v3 = vsel %vm1396_vm3, %v1472_v42, %v5343_v17  ;;  %v1678_v40 = vsel %vm1605_vm4, %v1676_v58, %v5344_v19 }
 0x1fb   : > { %1740 = vrot.lane.b32.xlu1 %v1675_v35, %s4153_s9  ;;  %1531 = vrot.lane.b32.xlu0 %v1466_v56, %s4152_s21  ;;  %v1682_v29 = vrot.slane %v4489_v1, 4 }
 0x1fc   : > { %3820 = vmatprep.subr.mxu1 %v5340_v36  ;;  %3818 = vmatmul.mubr.msk.f32.vlgmr.msra.gmra.mxu1 %vm1901_vm6, %v5005_v0  ;;  %v1376_v16 = vadd.f32 %v1293_v22, %v1167_v20 }
 0x1fd   : > { %v1713_v2 = vpop.permute.xlu1 %1712  ;;  %v1504_v31 = vpop.permute.xlu0 %1503  ;;  %3824 = vmatprep.mubr.msk.f32.mxu1 %vm4155_vm5, %v5340_v36  ;;  %v1683_v56 = vsel %vm1605_vm4, %v1681_v61, %v1682_v29  ;;  %v1685_v12 = vsel %vm1605_vm4, %v1682_v29, %v1684_v57  ;;  %v5058_v61 = vld [vmem:[%s4730_s20 + $0x7] sm:$0x1] }
 0x1fe   : > { %v1586_v44 = vadd.f32 %v1504_v31, %v1377_v45  ;;  %v5045_v45 = vld [vmem:[%s4730_s20 + $0x6] sm:$0x1] }
 0x1ff   : > { %1738 = vrot.lane.b32.xlu1 %v1673_v23, %s4153_s9  ;;  %1529 = vrot.lane.b32.xlu0 %v1464_v9, %s4152_s21 }
 0x200   : > { %v1795_v34 = vadd.f32 %v1713_v2, %v1586_v44 }
 0x201   : > { %v1711_v32 = vpop.permute.xlu1 %1710  ;;  %v1502_v60 = vpop.permute.xlu0 %1501 }
 0x202   : > { %v1834_v27 = vadd.f32 %v4699_v46, %v1795_v34  ;;  %v1585_v18 = vadd.f32 %v1502_v60, %v1376_v16 }
 0x203   : > { %1537 = vrot.lane.b32.xlu1 %v1474_v3, %s4152_s21  ;;  %1742 = vrot.lane.b32.xlu0 %v1678_v40, %s4153_s9  ;;  %s5273_s21 = scalar_lea.hbm %s5325_s7, %s3621_s22 }
 0x204   : > { %v1866_v47 = vmax.f32 %v1834_v27, 0.0  ;;  %v1794_v13 = vadd.f32 %v1711_v32, %v1585_v18 }
 0x205   : > { %v1299_v22 = vpop.permute.xlu1 %1298  ;;  %v1090_v54 = vpop.permute.xlu0 %1089 }
 0x206   : > { %v1833_v35 = vadd.f32 %v4699_v46, %v1794_v13  ;;  %3821 = vmatpush3.msra.mxu1 %v1866_v47  ;;  %v1170_v20 = vadd.f32 %v1090_v54, %v4538_v43 }
 0x207   : > { %1746 = vrot.lane.b32.xlu1 %v1683_v56, %s4153_s9  ;;  %1748 = vrot.lane.b32.xlu0 %v1685_v12, %s4153_s9  ;;  %s3416_s9 = scalar_lea.sflag [#allocation4], %s4296_s17 }
 0x208   : > { %v1865_v10 = vmax.f32 %v1833_v35, 0.0  ;;  %3822 = vmatprep.subr.mxu1 %v5340_v36  ;;  %v1379_v58 = vadd.f32 %v1299_v22, %v1170_v20 }
 0x209   : > { %v1297_v2 = vpop.permute.xlu1 %1296  ;;  %v1088_v31 = vpop.permute.xlu0 %1087 }
 0x20a   : > { %3823 = vmatpush3.msra.mxu1 %v1865_v10  ;;  %v1169_v42 = vadd.f32 %v1088_v31, %v4526_v30 }
 0x20b   : > { %3827 = vmatprep.subr.mxu1 %v5340_v36  ;;  %3825 = vmatmul.mubr.msk.f32.vlgmr.msra.gmra.mxu1 %vm1901_vm6, %v5045_v45 }
 0x20c   : > { %3831 = vmatprep.mubr.msk.f32.mxu1 %vm4155_vm5, %v5340_v36  ;;  %v1378_v34 = vadd.f32 %v1297_v2, %v1169_v42 }
 0x20d   : > { %v1717_v44 = vpop.permute.xlu1 %1716  ;;  %v1508_v43 = vpop.permute.xlu0 %1507 }
 0x20e   : > { %v1588_v23 = vadd.f32 %v1508_v43, %v1379_v58 }
 0x210   : > { %v1797_v9 = vadd.f32 %v1717_v44, %v1588_v23 }
 0x211   : > { %v1715_v16 = vpop.permute.xlu1 %1714  ;;  %v1506_v57 = vpop.permute.xlu0 %1505 }
 0x212   : > { %v1836_v32 = vadd.f32 %v4699_v46, %v1797_v9  ;;  %v1587_v60 = vadd.f32 %v1506_v57, %v1378_v34  ;;  %v3077_v9 = vsel %vm3070_vm7, %v4881_v6, 0.0  ;;  %v1893_v57 = vld [vmem:[%s4730_s20 + $0x8] sm:$0x1] }
 0x214   : > { %v1868_v17 = vmax.f32 %v1836_v32, 0.0  ;;  %v1796_v3 = vadd.f32 %v1715_v16, %v1587_v60  ;;  %v1894_v32 = vld [vmem:[%s4730_s20 + $0x9] sm:$0x1] }
 0x215   : > { %v1303_v19 = vpop.permute.xlu1 %1302  ;;  %v1094_v40 = vpop.permute.xlu0 %1093 }
 0x216   : > { %v1835_v30 = vadd.f32 %v4699_v46, %v1796_v3  ;;  %3828 = vmatpush3.msra.mxu1 %v1868_v17  ;;  %v1172_v18 = vadd.f32 %v1094_v40, %v4558_v5  ;;  %v3098_v17 = vsel %vm3070_vm7, %v1894_v32, 0.0  ;;  %v5078_v3 = vld [vmem:[%s4730_s20 + $0xa] sm:$0x1] }
 0x217   : > { %3829 = vmatprep.subr.mxu1 %v5340_v36  ;;  %v3101_v6 = vsel %vm3070_vm7, %v5078_v3, 0.0 }
 0x218   : > { %v1867_v27 = vmax.f32 %v1835_v30, 0.0  ;;  %v1381_v22 = vadd.f32 %v1303_v19, %v1172_v18 }
 0x219   : > { %v1301_v29 = vpop.permute.xlu1 %1300  ;;  %v1092_v47 = vpop.permute.xlu0 %1091 }
 0x21a   : > { %3830 = vmatpush3.msra.mxu1 %v1867_v27  ;;  %v1171_v13 = vadd.f32 %v1092_v47, %v4548_v55  ;;  %v3074_v55 = vsel %vm3070_vm7, %v4818_v51, 0.0  ;;  %v3071_v27 = vsel %vm3070_vm7, %v4739_v14, 0.0 }
 0x21b   : > { %3834 = vmatprep.subr.mxu1 %v5340_v36  ;;  %3832 = vmatmul.mubr.msk.f32.vlgmr.msra.gmra.mxu1 %vm1901_vm6, %v5058_v61 }
 0x21c   : > { %3838 = vmatprep.mubr.msk.f32.mxu1 %vm4155_vm5, %v5340_v36  ;;  %v1380_v12 = vadd.f32 %v1301_v29, %v1171_v13  ;;  %v3080_v29 = vsel %vm3070_vm7, %v4922_v25, 0.0 }
 0x21d   : > { %v1721_v54 = vpop.permute.xlu1 %1720  ;;  %v1512_v35 = vpop.permute.xlu0 %1511 }
 0x21e   : > { %v1590_v56 = vadd.f32 %v1512_v35, %v1381_v22 }
 0x220   : > { %v1799_v5 = vadd.f32 %v1721_v54, %v1590_v56  ;;  %v3095_v54 = vsel %vm3070_vm7, %v1893_v57, 0.0 }
 0x221   : > { %v1719_v10 = vpop.permute.xlu1 %1718  ;;  %v1510_v20 = vpop.permute.xlu0 %1509 }
 0x222   : > { %v1838_v2 = vadd.f32 %v4699_v46, %v1799_v5  ;;  %v1589_v31 = vadd.f32 %v1510_v20, %v1380_v12  ;;  %v5094_v5 = vld [vmem:[%s4730_s20 + $0xb] sm:$0x1] }
 0x223   : > { %v3104_v14 = vsel %vm3070_vm7, %v5094_v5, 0.0 }
 0x224   : > { %v1870_v42 = vmax.f32 %v1838_v2, 0.0  ;;  %v1798_v58 = vadd.f32 %v1719_v10, %v1589_v31  ;;  %v3083_v2 = vsel %vm3070_vm7, %v4963_v26, 0.0 }
 0x225   : > { %v1307_v44 = vpop.permute.xlu1 %1306  ;;  %v1098_v43 = vpop.permute.xlu0 %1097 }
 0x226   : > { %v1837_v23 = vadd.f32 %v4699_v46, %v1798_v58  ;;  %3835 = vmatpush3.msra.mxu1 %v1870_v42  ;;  %3075 = vadd.xlane.f32.xlu0 %v3074_v55  ;;  %v1174_v16 = vadd.f32 %v1098_v43, %v4578_v28  ;;  %v5107_v55 = vld [vmem:[%s4730_s20 + $0xc] sm:$0x1] }
 0x227   : > { %3836 = vmatprep.subr.mxu1 %v5340_v36  ;;  %v3107_v42 = vsel %vm3070_vm7, %v5107_v55, 0.0 }
 0x228   : > { %v1869_v34 = vmax.f32 %v1837_v23, 0.0  ;;  %v1383_v28 = vadd.f32 %v1307_v44, %v1174_v16  ;;  %v3086_v23 = vsel %vm3070_vm7, %v5005_v0, 0.0 }
 0x229   : > { %v1305_v51 = vpop.permute.xlu1 %1304  ;;  %v1096_v60 = vpop.permute.xlu0 %1095 }
 0x22a   : > { %3837 = vmatpush3.msra.mxu1 %v1869_v34  ;;  %3078 = vadd.xlane.f32.xlu0 %v3077_v9  ;;  %v1173_v19 = vadd.f32 %v1096_v60, %v4568_v11  ;;  %v5116_v9 = vld [vmem:[%s4730_s20 + $0xd] sm:$0x1] }
 0x22b   : > { %3841 = vmatprep.subr.mxu1 %v5340_v36  ;;  %3839 = vmatmul.mubr.msk.f32.vlgmr.msra.gmra.mxu1 %vm1901_vm6, %v1893_v57  ;;  %v3110_v34 = vsel %vm3070_vm7, %v5116_v9, 0.0 }
 0x22c   : > { %3845 = vmatprep.mubr.msk.f32.mxu1 %vm4155_vm5, %v5340_v36  ;;  %3099 = vadd.xlane.f32.xlu1 %v3098_v17  ;;  %v1382_v13 = vadd.f32 %v1305_v51, %v1173_v19  ;;  %v3089_v51 = vsel %vm3070_vm7, %v5045_v45, 0.0  ;;  %v5128_v17 = vld [vmem:[%s4730_s20 + $0xe] sm:$0x1] }
 0x22d   : > { %v1725_v40 = vpop.permute.xlu1 %1724  ;;  %v1516_v30 = vpop.permute.xlu0 %1515 }
 0x22e   : > { %v1592_v18 = vadd.f32 %v1516_v30, %v1383_v28  ;;  %3102 = vadd.xlane.f32.xlu0 %v3101_v6 }
 0x230   : > { %v1801_v47 = vadd.f32 %v1725_v40, %v1592_v18  ;;  %3072 = vadd.xlane.f32.xlu1 %v3071_v27  ;;  %v3092_v40 = vsel %vm3070_vm7, %v5058_v61, 0.0  ;;  %v5136_v18 = vld [vmem:[%s4730_s20 + $0xf] sm:$0x1]  ;;  %s3520_s20 = sshll.u32 %s4296_s17, 4 }
 0x231   : > { %v1723_v11 = vpop.permute.xlu1 %1722  ;;  %v1514_v22 = vpop.permute.xlu0 %1513  ;;  %v3116_v45 = vsel %vm3070_vm7, %v5136_v18, 0.0  ;;  %s311_s23 = scalar_lea.vmem [#allocation5], %s3520_s20 }
 0x232   : > { %v1840_v35 = vadd.f32 %v4699_v46, %v1801_v47  ;;  %v1591_v56 = vadd.f32 %v1514_v22, %v1382_v13  ;;  %3081 = vadd.xlane.f32.xlu0 %v3080_v29  ;;  %v5103_v46 = vld [vmem:[%s5321_s3] ss:$0 sm:$0xff]  ;;  %s3429_s29 = sshll.u32 %s311_s23, 4  ;;  %s5275_s29 = int_to_ptr.vmem [resolvable:$true] %s3429_s29 }
 0x233   : > { %s4081_s8 = scalar_lea.vmem %s5275_s29, 256  ;;  %p4088_p7 = scmp.lt.s32.totalorder %s5275_s29, %s4086_s16 }
 0x234   : > { %v1872_v12 = vmax.f32 %v1840_v35, 0.0  ;;  %v1800_v10 = vadd.f32 %v1723_v11, %v1591_v56  ;;  %3096 = vadd.xlane.f32.xlu1 %v3095_v54  ;;  %p4082_p12 = scmp.ne.s32.totalorder %s5275_s29, %s4081_s8  ;;  %p4089_p8 = scmp.lt.s32.totalorder %s4087_s11, %s4081_s8 }
 0x235   : > { %v1311_v25 = vpop.permute.xlu1 %1310  ;;  %v1102_v20 = vpop.permute.xlu0 %1101 }
 0x236   : > { %v1839_v31 = vadd.f32 %v5103_v46, %v1800_v10  ;;  %3842 = vmatpush3.msra.mxu1 %v1872_v12  ;;  %3105 = vadd.xlane.f32.xlu0 %v3104_v14  ;;  %v1176_v44 = vadd.f32 %v1102_v20, %v4598_v59  ;;  %p4083_p4 = pnand %p4082_p12, %p5349_p13  ;;  %p4090_p10 = por %p4089_p8, %p4088_p7 }
 0x237   : > { %3843 = vmatprep.subr.mxu1 %v5340_v36 }
 0x238   : > { %v1871_v58 = vmax.f32 %v1839_v31, 0.0  ;;  %3084 = vadd.xlane.f32.xlu1 %v3083_v2  ;;  %v1385_v16 = vadd.f32 %v1311_v25, %v1176_v44  ;;  %p4084_p5 = pneg %p4083_p4 }
 0x239   : > { %v1309_v26 = vpop.permute.xlu1 %1308  ;;  %v1100_v43 = vpop.permute.xlu0 %1099 }
 0x23a   : > { %3844 = vmatpush3.msra.mxu1 %v1871_v58  ;;  %3108 = vadd.xlane.f32.xlu0 %v3107_v42  ;;  %v1175_v59 = vadd.f32 %v1100_v43, %v4588_v39  ;;  %p4091_p0 = pnand %p4090_p10, %p4084_p5 }
 0x23b   : > { %3848 = vmatprep.subr.mxu1 %v5340_v36  ;;  %3846 = vmatmul.mubr.msk.f32.vlgmr.msra.gmra.mxu1 %vm1901_vm6, %v1894_v32  ;;  %v3113_v32 = vsel %vm3070_vm7, %v5128_v17, 0.0 }
 0x23c   : > { %3852 = vmatprep.mubr.msk.f32.mxu1 %vm4155_vm5, %v5340_v36  ;;  %3087 = vadd.xlane.f32.xlu1 %v3086_v23  ;;  %v1384_v39 = vadd.f32 %v1309_v26, %v1175_v59 }
 0x23d   : > { %v1729_v0 = vpop.permute.xlu1 %1728  ;;  %v1520_v57 = vpop.permute.xlu0 %1519 }
 0x23e   : > { %v1594_v60 = vadd.f32 %v1520_v57, %v1385_v16  ;;  %3111 = vadd.xlane.f32.xlu0 %v3110_v34 }
 0x240   : > { %v1803_v6 = vadd.f32 %v1729_v0, %v1594_v60  ;;  %3090 = vadd.xlane.f32.xlu1 %v3089_v51 }
 0x241   : > { %v1727_v19 = vpop.permute.xlu1 %1726  ;;  %v1518_v28 = vpop.permute.xlu0 %1517 }
 0x242   : > { %v1842_v30 = vadd.f32 %v5103_v46, %v1803_v6  ;;  %v1593_v27 = vadd.f32 %v1518_v28, %v1384_v39  ;;  %3114 = vadd.xlane.f32.xlu0 %v3113_v32 }
 0x244   : > { %v1874_v29 = vmax.f32 %v1842_v30, 0.0  ;;  %v1802_v47 = vadd.f32 %v1727_v19, %v1593_v27  ;;  %3093 = vadd.xlane.f32.xlu1 %v3092_v40 }
 0x245   : > { %v1315_v13 = vpop.permute.xlu1 %1314  ;;  %v1106_v11 = vpop.permute.xlu0 %1105 }
 0x246   : > { %v1841_v22 = vadd.f32 %v5103_v46, %v1802_v47  ;;  %3849 = vmatpush3.msra.mxu1 %v1874_v29  ;;  %3117 = vadd.xlane.f32.xlu0 %v3116_v45  ;;  %v1178_v54 = vadd.f32 %v1106_v11, %v4618_v21  ;;  %v1184_v11 = vadd.f32 %v4719_v49, %v4384_v41 }
 0x247   : > { %3850 = vmatprep.subr.mxu1 %v5340_v36  ;;  %v1183_v41 = vadd.f32 %v4736_v4, %v4380_v37  ;;  %v1186_v4 = vadd.f32 %v4797_v48, %v4489_v1  ;;  %v5348_v1 = vld [vmem:[#allocation10_spill] sm:$0xff] }
 0x248   : > { %v1873_v61 = vmax.f32 %v1841_v22, 0.0  ;;  %v1387_v12 = vadd.f32 %v1315_v13, %v1178_v54 }
 0x249   : > { %v1313_v35 = vpop.permute.xlu1 %1312  ;;  %v1104_v56 = vpop.permute.xlu0 %1103 }
 0x24a   : > { %3851 = vmatpush3.msra.mxu1 %v1873_v61  ;;  %v1177_v14 = vadd.f32 %v1104_v56, %v4608_v7  ;;  %v1393_v56 = vadd.f32 %v4717_v63, %v1184_v11 }
 0x24b   : > { %3855 = vmatprep.subr.mxu1 %v5340_v36  ;;  %3853 = vmatmul.mubr.msk.f32.vlgmr.msra.gmra.mxu1 %vm1901_vm6, %v5078_v3 }
 0x24c   : > { %3859 = vmatprep.mubr.msk.f32.mxu1 %vm4155_vm5, %v5340_v36  ;;  %v1386_v31 = vadd.f32 %v1313_v35, %v1177_v14  ;;  %v1602_v49 = vadd.f32 %v4754_v33, %v1393_v56  ;;  %v1185_v33 = vadd.f32 %v4810_v53, %v4399_v52 }
 0x24d   : > { %v1733_v10 = vpop.permute.xlu1 %1732  ;;  %v1524_v25 = vpop.permute.xlu0 %1523 }
 0x24e   : > { %v1596_v20 = vadd.f32 %v1524_v25, %v1387_v12 }
 0x250   : > { %v1805_v2 = vadd.f32 %v1733_v10, %v1596_v20 }
 0x251   : > { %v1731_v21 = vpop.permute.xlu1 %1730  ;;  %v1522_v42 = vpop.permute.xlu0 %1521 }
 0x252   : > { %v1844_v58 = vadd.f32 %v5103_v46, %v1805_v2  ;;  %v1595_v44 = vadd.f32 %v1522_v42, %v1386_v31  ;;  %v1392_v2 = vadd.f32 %v4734_v24, %v1183_v41 }
 0x254   : > { %v1876_v26 = vmax.f32 %v1844_v58, 0.0  ;;  %v1804_v43 = vadd.f32 %v1731_v21, %v1595_v44  ;;  %v5150_v23 = vpop.f32.mrf.mxu1  ;;  %v5345_v44 = vld [vmem:[#allocation8_spill] sm:$0xff] }
 0x255   : > { %v1319_v3 = vpop.permute.xlu1 %1318  ;;  %v1110_v7 = vpop.permute.xlu0 %1109  ;;  %v1601_v37 = vadd.f32 %v5345_v44, %v1392_v2 }
 0x256   : > { %v1843_v34 = vadd.f32 %v5103_v46, %v1804_v43  ;;  %3856 = vmatpush3.msra.mxu1 %v1876_v26  ;;  %v3784_v59 = vpop.f32.mrf.mxu1  ;;  %v1180_v0 = vadd.f32 %v1110_v7, %v4638_v62 }
 0x257   : > { %3857 = vmatprep.subr.mxu1 %v5340_v36 }
 0x258   : > { %v1875_v16 = vmax.f32 %v1843_v34, 0.0  ;;  %v1389_v32 = vadd.f32 %v1319_v3, %v1180_v0  ;;  %v5346_v34 = vld [vmem:[#allocation9_spill] sm:$0xff] }
 0x259   : > { %v1317_v57 = vpop.permute.xlu1 %1316  ;;  %v1108_v51 = vpop.permute.xlu0 %1107  ;;  %v1395_v59 = vadd.f32 %v5346_v34, %v1186_v4 }
 0x25a   : > { %3858 = vmatpush3.msra.mxu1 %v1875_v16  ;;  %v1179_v60 = vadd.f32 %v1108_v51, %v4628_v38  ;;  %v5347_v16 = vld [vmem:[#allocation11_spill] sm:$0xff] }
 0x25b   : > { %3862 = vmatprep.subr.mxu1 %v5340_v36  ;;  %3860 = vmatmul.mubr.msk.f32.vlgmr.msra.gmra.mxu1 %vm1901_vm6, %v5094_v5  ;;  %v1394_v0 = vadd.f32 %v5347_v16, %v1185_v33  ;;  %v1604_v48 = vadd.f32 %v5348_v1, %v1395_v59  ;;  %v4001_v1 = vld [vmem:[%s5322_s4] sm:$0xff]  }
 0x25c   : > { %3866 = vmatprep.mubr.msk.f32.mxu1 %vm4155_vm5, %v5340_v36  ;;  %v1388_v40 = vadd.f32 %v1317_v57, %v1179_v60 }
 0x25d   : > { %v1737_v6 = vpop.permute.xlu1 %1736  ;;  %v1528_v39 = vpop.permute.xlu0 %1527 }
 0x25e   : > { %v1598_v19 = vadd.f32 %v1528_v39, %v1389_v32 }
 0x260   : > { %v1807_v28 = vadd.f32 %v1737_v6, %v1598_v19 }
 0x261   : > { %v1735_v62 = vpop.permute.xlu1 %1734  ;;  %v1526_v30 = vpop.permute.xlu0 %1525 }
 0x262   : > { %v1846_v27 = vadd.f32 %v5103_v46, %v1807_v28  ;;  %v1597_v45 = vadd.f32 %v1526_v30, %v1388_v40 }
 0x264   : > { %v1878_v29 = vmax.f32 %v1846_v27, 0.0  ;;  %v1806_v47 = vadd.f32 %v1735_v62, %v1597_v45 }
 0x265   : > { %v1323_v13 = vpop.permute.xlu1 %1322  ;;  %v1114_v5 = vpop.permute.xlu0 %1113 }
 0x266   : > { %v1845_v38 = vadd.f32 %v5103_v46, %v1806_v47  ;;  %3863 = vmatpush3.msra.mxu1 %v1878_v29  ;;  %v1182_v61 = vadd.f32 %v1114_v5, %v4968_v15 }
 0x267   : > { %3864 = vmatprep.subr.mxu1 %v5340_v36 }
 0x268   : > { %v1877_v22 = vmax.f32 %v1845_v38, 0.0  ;;  %v1391_v12 = vadd.f32 %v1323_v13, %v1182_v61 }
 0x269   : > { %v1321_v54 = vpop.permute.xlu1 %1320  ;;  %v1112_v35 = vpop.permute.xlu0 %1111 }
 0x26a   : > { %3865 = vmatpush3.msra.mxu1 %v1877_v22  ;;  %v1181_v14 = vadd.f32 %v1112_v35, %v4648_v8 }
 0x26b   : > { %3867 = vmatmul.mubr.msk.f32.vlgmr.msra.gmra.mxu1 %vm1901_vm6, %v5107_v55  ;;  %3869 = vmatprep.subr.mxu1 %v5340_v36  ;;  %v1811_v55 = vadd.f32 %v4752_v50, %v1602_v49 }
 0x26c   : > { %3873 = vmatprep.mubr.msk.f32.mxu1 %vm4155_vm5, %v5340_v36  ;;  %v1390_v20 = vadd.f32 %v1321_v54, %v1181_v14 }
 0x26d   : > { %v1741_v15 = vpop.permute.xlu1 %1740  ;;  %v1532_v10 = vpop.permute.xlu0 %1531  ;;  %v1850_v24 = vadd.f32 %v5103_v46, %v1811_v55 }
 0x26e   : > { %v1600_v25 = vadd.f32 %v1532_v10, %v1391_v12 }
 0x26f   : > { %v1882_v39 = vmax.f32 %v1850_v24, 0.0 }
 0x270   : > { %v1809_v63 = vadd.f32 %v1741_v15, %v1600_v25 }
 0x271   : > { %v1739_v31 = vpop.permute.xlu1 %1738  ;;  %v1530_v8 = vpop.permute.xlu0 %1529 }
 0x272   : > { %v1848_v21 = vadd.f32 %v5103_v46, %v1809_v63  ;;  %v1599_v42 = vadd.f32 %v1530_v8, %v1390_v20  ;;  %v5180_v58 = vpop.f32.mrf.mxu1 }
 0x274   : > { %v1880_v26 = vmax.f32 %v1848_v21, 0.0  ;;  %v1808_v43 = vadd.f32 %v1739_v31, %v1599_v42  ;;  %v3791_v50 = vpop.f32.mrf.mxu1 }
 0x275   : > { %v1538_v3 = vpop.permute.xlu1 %1537  ;;  %v1743_v7 = vpop.permute.xlu0 %1742 }
 0x276   : > { %v1847_v57 = vadd.f32 %v5103_v46, %v1808_v43  ;;  %v1810_v51 = vadd.f32 %v1743_v7, %v1601_v37  ;;  %3870 = vmatpush3.msra.mxu1 %v1880_v26  ;;  %v1603_v53 = vadd.f32 %v1538_v3, %v1394_v0 }
 0x277   : > { %3871 = vmatprep.subr.mxu1 %v5340_v36 }
 0x278   : > { %v1879_v52 = vmax.f32 %v1847_v57, 0.0  ;;  %v1849_v60 = vadd.f32 %v5103_v46, %v1810_v51 }
 0x279   : > { %v1747_v32 = vpop.permute.xlu1 %1746  ;;  %v1749_v6 = vpop.permute.xlu0 %1748 }
 0x27a   : > { %v1812_v19 = vadd.f32 %v1747_v32, %v1603_v53  ;;  %v1813_v28 = vadd.f32 %v1749_v6, %v1604_v48  ;;  %3872 = vmatpush3.msra.mxu1 %v1879_v52  ;;  %v1881_v40 = vmax.f32 %v1849_v60, 0.0 }
 0x27b   : > { %3874 = vmatmul.mubr.msk.f32.vlgmr.msra.gmra.mxu1 %vm1901_vm6, %v5116_v9  ;;  %3876 = vmatprep.subr.mxu1 %v5340_v36 }
 0x27c   : > { %v1851_v62 = vadd.f32 %v5103_v46, %v1812_v19  ;;  %v1852_v30 = vadd.f32 %v5103_v46, %v1813_v28  ;;  %3877 = vmatpush3.msra.mxu1 %v1882_v39  ;;  %3880 = vmatprep.mubr.msk.f32.mxu1 %vm4155_vm5, %v5340_v36 }
 0x27d   : > { %3878 = vmatprep.subr.mxu1 %v5340_v36 }
 0x27e   : > { %v1884_v27 = vmax.f32 %v1852_v30, 0.0  ;;  %3879 = vmatpush3.msra.mxu1 %v1881_v40  ;;  %v1883_v9 = vmax.f32 %v1851_v62, 0.0 }
 0x27f   : > { %3881 = vmatmul.mubr.msk.f32.vlgmr.msra.gmra.mxu1 %vm1901_vm6, %v5128_v17  ;;  %3883 = vmatprep.subr.mxu1 %v5340_v36 }
 0x280   : > { %3884 = vmatpush3.msra.mxu1 %v1884_v27  ;;  %3887 = vmatprep.mubr.msk.f32.mxu1 %vm4155_vm5, %v5340_v36 }
 0x281   : > { %3885 = vmatprep.subr.mxu1 %v5340_v36 }
 0x282   : > { %3886 = vmatpush3.msra.mxu1 %v1883_v9 }
 0x283   : > { %3888 = vmatmul.mubr.msk.f32.vlgmr.msra.gmra.mxu1 %vm1901_vm6, %v5136_v18  ;;  %3890 = vmatprep.subr.bf16.mxu1 %v5340_v36 }
 0x284   : > { %3894 = vmatprep.mubr.msk.bf16.mxu1 %vm4155_vm5, %v5340_v36 }
 0x28c   : > { %v2117_v46 = vpop.f32.mrf.mxu1 }
 0x28e   : > { %v3798_v17 = vpop.f32.mrf.mxu1 }
 0x29c   : > { %v2190_v45 = vpop.f32.mrf.mxu1 }
 0x29e   : > { %v3805_v29 = vpop.f32.mrf.mxu1 }
 0x2ac   : > { %v5213_v47 = vpop.f32.mrf.mxu1 }
 0x2ae   : > { %v3812_v13 = vpop.f32.mrf.mxu1 }
 0x2af   : > { %v3076_v5 = vpop.xlane.xlu0 %3075 }
 0x2b0   : > { %v3120_v38 = vadd.f32 1e-06, %v3076_v5 }
 0x2b2   : > { %4004 = vrcp.f32 %v3120_v38 }
 0x2b3   : > { %v3079_v11 = vpop.xlane.xlu0 %3078 }
 0x2b4   : > { %v3121_v22 = vadd.f32 1e-06, %v3079_v11 }
 0x2b5   : > { %v5215_v61 = vpop.xlane.xlu1 %3099 }
 0x2b6   : > { %4006 = vrcp.f32 %v3121_v22 }
 0x2b7   : > { %v5217_v18 = vpop.xlane.xlu0 %3102 }
 0x2b9   : > { %v3073_v54 = vpop.xlane.xlu1 %3072 }
 0x2ba   : > { %v3119_v35 = vadd.f32 1e-06, %v3073_v54 }
 0x2bb   : > { %v3082_v56 = vpop.xlane.xlu0 %3081 }
 0x2bc   : > { %4008 = vrcp.f32 %v3119_v35  ;;  %v3122_v14 = vadd.f32 1e-06, %v3082_v56  ;;  %v2336_v12 = vpop.f32.mrf.mxu1 }
 0x2bd   : > { %v5219_v41 = vpop.xlane.xlu1 %3096 }
 0x2be   : > { %4010 = vrcp.f32 %v3122_v14  ;;  %v3819_v49 = vpop.f32.mrf.mxu1 }
 0x2bf   : > { %v4005_v15 = vpop.eup %4004  ;;  %v3127_v49 = vadd.f32 1e-06, %v5219_v41 }
 0x2c0   : > { %v3152_v10 = vmul.f32 %v4005_v15, %v5180_v58  ;;  %v4000_v58 = vld [vmem:[%s5322_s4 + $0x8] ss:$0 sps:$4 sm:$0xff]  }
 0x2c1   : > { %v3085_v25 = vpop.xlane.xlu1 %3084  ;;  %v3268_v0 = vsel %vm1605_vm4, %v4000_v58, 0 }
 0x2c2   : > { %v3123_v63 = vadd.f32 1e-06, %v3085_v25  ;;  %v3168_v55 = vpack.c.bf16 %v3152_v10, %v3152_v10  ;;  %3891 = vmatpush3.bf16.msra.mxu1 %v3268_v0  ;;  %v3128_v25 = vadd.f32 1e-06, %v5215_v61  ;;  %v3106_v61 = vpop.xlane.xlu0 %3105 }
 0x2c3   : > { %v4007_v20 = vpop.eup %4006  ;;  %3892 = vmatprep.subr.bf16.mxu1 %v5340_v36 }
 0x2c4   : > { %4012 = vrcp.f32 %v3123_v63  ;;  %v3153_v2 = vmul.f32 %v4007_v20, %v2117_v46  ;;  %v3203_v42 = vunpack.c.l.b16 %v3168_v55 }
 0x2c5   : > { %v3088_v31 = vpop.xlane.xlu1 %3087 }
 0x2c6   : > { %v3124_v8 = vadd.f32 1e-06, %v3088_v31  ;;  %v3169_v21 = vpack.c.bf16 %v3153_v2, %v3153_v2  ;;  %v3218_v3 = vrot.slane %v3203_v42, 7  ;;  %3893 = vmatpush3.bf16.msra.mxu1 %v4001_v1 }
 0x2c7   : > { %3898 = vmatprep.subr.bf16.mxu1 %v5340_v36 }
 0x2c8   : > { %4014 = vrcp.f32 %v3124_v8  ;;  %v3204_v37 = vunpack.c.l.b16 %v3169_v21 }
 0x2c9   : > { %v4009_v44 = vpop.eup %4008  ;;  %v3091_v4 = vpop.xlane.xlu1 %3090 }
 0x2ca   : > { %v3151_v33 = vmul.f32 %v4009_v44, %v5150_v23  ;;  %v3125_v26 = vadd.f32 1e-06, %v3091_v4  ;;  %v3221_v34 = vrot.slane %v3204_v37, 6 }
 0x2cb   : > { %v4011_v43 = vpop.eup %4010  ;;  %v2409_v50 = vpop.f32.mrf.mxu1 }
 0x2cc   : > { %v3167_v24 = vpack.c.bf16 %v3151_v33, %v3151_v33  ;;  %4016 = vrcp.f32 %v3125_v26  ;;  %v3154_v7 = vmul.f32 %v4011_v43, %v2190_v45 }
 0x2cd   : > { %v3094_v59 = vpop.xlane.xlu1 %3093  ;;  %v3826_v16 = vpop.f32.mrf.mxu1 }
 0x2ce   : > { %v3202_v57 = vunpack.c.l.b16 %v3167_v24  ;;  %v3170_v23 = vpack.c.bf16 %v3154_v7, %v3154_v7  ;;  %v3126_v51 = vadd.f32 1e-06, %v3094_v59  ;;  %v3109_v24 = vpop.xlane.xlu0 %3108  ;;  %v3129_v7 = vadd.f32 1e-06, %v5217_v18 }
 0x2cf   : > { %v3130_v59 = vadd.f32 1e-06, %v3106_v61  ;;  %v3131_v16 = vadd.f32 1e-06, %v3109_v24 }
 0x2d0   : > { %v3220_v48 = vsel %vm3219_vm8, %v3218_v3, %v3202_v57  ;;  %v3205_v52 = vunpack.c.l.b16 %v3170_v23  ;;  %4018 = vrcp.f32 %v3126_v51 }
 0x2d1   : > { %v4013_v53 = vpop.eup %4012  ;;  %v3223_v60 = vsel %vm3222_vm9, %v3221_v34, %v3220_v48  ;;  %4020 = vrcp.f32 %v3127_v49 }
 0x2d2   : > { %v3224_v32 = vrot.slane %v3205_v52, 5  ;;  %v3155_v6 = vmul.f32 %v4013_v53, %v5213_v47  ;;  %4022 = vrcp.f32 %v3128_v25  ;;  %v3112_v34 = vpop.xlane.xlu0 %3111 }
 0x2d3   : > { %4024 = vrcp.f32 %v3129_v7  ;;  %v3132_v57 = vadd.f32 1e-06, %v3112_v34  ;;  %v4003_v7 = vld [vmem:[%s5323_s5] sm:$0xff]  }
 0x2d4   : > { %v3226_v39 = vsel %vm3225_vm10, %v3224_v32, %v3223_v60  ;;  %v3171_v19 = vpack.c.bf16 %v3155_v6, %v3155_v6  ;;  %4026 = vrcp.f32 %v3130_v59 }
 0x2d5   : > { %v4015_v28 = vpop.eup %4014  ;;  %4028 = vrcp.f32 %v3131_v16 }
 0x2d6   : > { %v3206_v40 = vunpack.c.l.b16 %v3171_v19  ;;  %v3156_v62 = vmul.f32 %v4015_v28, %v2336_v12  ;;  %v3115_v0 = vpop.xlane.xlu0 %3114  ;;  %4030 = vrcp.f32 %v3132_v57 }
 0x2d7   : > { %v3133_v51 = vadd.f32 1e-06, %v3115_v0 }
 0x2d8   : > { %v3227_v30 = vrot.slane %v3206_v40, 4  ;;  %v3172_v27 = vpack.c.bf16 %v3156_v62, %v3156_v62 }
 0x2d9   : > { %v4017_v9 = vpop.eup %4016  ;;  %4032 = vrcp.f32 %v3133_v51 }
 0x2da   : > { %v3229_v46 = vsel %vm3228_vm11, %v3227_v30, %v3226_v39  ;;  %v3207_v17 = vunpack.c.l.b16 %v3172_v27  ;;  %v3157_v45 = vmul.f32 %v4017_v9, %v2409_v50  ;;  %v3118_v1 = vpop.xlane.xlu0 %3117 }
 0x2db   : > { %v2482_v29 = vpop.f32.mrf.mxu1  ;;  %v3134_v52 = vadd.f32 1e-06, %v3118_v1 }
 0x2dc   : > { %v3230_v47 = vrot.slane %v3207_v17, 3  ;;  %v3173_v13 = vpack.c.bf16 %v3157_v45, %v3157_v45 }
 0x2dd   : > { %v4019_v5 = vpop.eup %4018  ;;  %v3833_v38 = vpop.f32.mrf.mxu1  ;;  %4034 = vrcp.f32 %v3134_v52 }
 0x2de   : > { %v3232_v11 = vsel %vm3231_vm12, %v3230_v47, %v3229_v46  ;;  %v3208_v22 = vunpack.c.l.b16 %v3173_v13  ;;  %v3158_v54 = vmul.f32 %v4019_v5, %v2482_v29  ;;  %v4021_v55 = vpop.eup %4020 }
 0x2df   : > { %v4023_v31 = vpop.eup %4022 }
 0x2e0   : > { %v3233_v35 = vrot.slane %v3208_v22, 2  ;;  %v3174_v56 = vpack.c.bf16 %v3158_v54, %v3158_v54  ;;  %v4025_v53 = vpop.eup %4024 }
 0x2e1   : > { %v4027_v60 = vpop.eup %4026 }
 0x2e2   : > { %v3235_v14 = vsel %vm3234_vm13, %v3233_v35, %v3232_v11  ;;  %v3209_v12 = vunpack.c.l.b16 %v3174_v56  ;;  %v4029_v18 = vpop.eup %4028 }
 0x2e3   : > { %v4031_v39 = vpop.eup %4030 }
 0x2e4   : > { %v3236_v15 = vrot.slane %v3209_v12, 1 }
 0x2e6   : > { %v5241_v10 = vsel %vm3237_vm14, %v3236_v15, %v3235_v14  ;;  %v4033_v27 = vpop.eup %4032 }
 0x2ea   : > { %v4035_v5 = vpop.eup %4034 }
 0x2eb   : > { %v2555_v63 = vpop.f32.mrf.mxu1 }
 0x2ec   : > { %v3159_v2 = vmul.f32 %v4021_v55, %v2555_v63 }
 0x2ed   : > { %v3840_v20 = vpop.f32.mrf.mxu1 }
 0x2ee   : > { %v3175_v21 = vpack.c.bf16 %v3159_v2, %v3159_v2 }
 0x2f0   : > { %v3210_v4 = vunpack.c.l.b16 %v3175_v21 }
 0x2fb   : > { %v2628_v8 = vpop.f32.mrf.mxu1 }
 0x2fc   : > { %v3160_v42 = vmul.f32 %v4023_v31, %v2628_v8 }
 0x2fd   : > { %v3847_v44 = vpop.f32.mrf.mxu1 }
 0x2fe   : > { %v3176_v37 = vpack.c.bf16 %v3160_v42, %v3160_v42 }
 0x300   : > { %v3211_v41 = vunpack.c.l.b16 %v3176_v37 }
 0x302   : > { %v3239_v33 = vrot.slane %v3211_v41, 7 }
 0x304   : > { %v3240_v26 = vsel %vm3219_vm8, %v3239_v33, %v3210_v4 }
 0x30b   : > { %v2701_v58 = vpop.f32.mrf.mxu1 }
 0x30c   : > { %v3161_v32 = vmul.f32 %v4025_v53, %v2701_v58 }
 0x30d   : > { %v3854_v43 = vpop.f32.mrf.mxu1 }
 0x30e   : > { %v3177_v19 = vpack.c.bf16 %v3161_v32, %v3161_v32 }
 0x310   : > { %v3212_v9 = vunpack.c.l.b16 %v3177_v19  ;;  %v3608_v19 = vld [vmem:[%s5324_s6] ss:$0 sm:$0xff] }
 0x312   : > { %v3241_v38 = vrot.slane %v3212_v9, 6 }
 0x314   : > { %v3242_v15 = vsel %vm3222_vm9, %v3241_v38, %v3240_v26 }
 0x31b   : > { %v2774_v50 = vpop.f32.mrf.mxu1 }
 0x31c   : > { %v3162_v6 = vmul.f32 %v4027_v60, %v2774_v50 }
 0x31d   : > { %v3861_v3 = vpop.f32.mrf.mxu1 }
 0x31e   : > { %v3178_v62 = vpack.c.bf16 %v3162_v6, %v3162_v6 }
 0x320   : > { %v3213_v47 = vunpack.c.l.b16 %v3178_v62 }
 0x322   : > { %v3243_v14 = vrot.slane %v3213_v47, 5 }
 0x324   : > { %v3244_v31 = vsel %vm3225_vm10, %v3243_v14, %v3242_v15 }
 0x32b   : > { %v2847_v23 = vpop.f32.mrf.mxu1 }
 0x32c   : > { %v3163_v28 = vmul.f32 %v4029_v18, %v2847_v23 }
 0x32d   : > { %v3868_v48 = vpop.f32.mrf.mxu1 }
 0x32e   : > { %v3179_v46 = vpack.c.bf16 %v3163_v28, %v3163_v28 }
 0x330   : > { %v3214_v11 = vunpack.c.l.b16 %v3179_v46 }
 0x332   : > { %v3245_v25 = vrot.slane %v3214_v11, 4 }
 0x334   : > { %v3246_v21 = vsel %vm3228_vm11, %v3245_v25, %v3244_v31 }
 0x33b   : > { %v2920_v40 = vpop.f32.mrf.mxu1 }
 0x33c   : > { %v3164_v30 = vmul.f32 %v4031_v39, %v2920_v40 }
 0x33d   : > { %v3875_v17 = vpop.f32.mrf.mxu1 }
 0x33e   : > { %v3180_v45 = vpack.c.bf16 %v3164_v30, %v3164_v30 }
 0x33f   : > { %v2993_v29 = vpop.f32.mrf.mxu1 }
 0x340   : > { %v3165_v13 = vmul.f32 %v4033_v27, %v2993_v29  ;;  %v3215_v54 = vunpack.c.l.b16 %v3180_v45 }
 0x341   : > { %v3882_v22 = vpop.f32.mrf.mxu1 }
 0x342   : > { %v3181_v35 = vpack.c.bf16 %v3165_v13, %v3165_v13  ;;  %v3247_v20 = vrot.slane %v3215_v54, 3 }
 0x343   : > { %v3066_v56 = vpop.f32.mrf.mxu1 }
 0x344   : > { %v3216_v12 = vunpack.c.l.b16 %v3181_v35  ;;  %v3166_v49 = vmul.f32 %v4035_v5, %v3066_v56  ;;  %v3248_v42 = vsel %vm3231_vm12, %v3247_v20, %v3246_v21 }
 0x345   : > { %v3889_v63 = vpop.f32.mrf.mxu1 }
 0x346   : > { %v3182_v55 = vpack.c.bf16 %v3166_v49, %v3166_v49  ;;  %v3249_v2 = vrot.slane %v3216_v12, 2 }
 0x348   : > { %v3217_v8 = vunpack.c.l.b16 %v3182_v55  ;;  %v3250_v37 = vsel %vm3234_vm13, %v3249_v2, %v3248_v42 }
 0x34a   : > { %v3251_v44 = vrot.slane %v3217_v8, 1 }
 0x34c   : > { %v3252_v4 = vsel %vm3237_vm14, %v3251_v44, %v3250_v37 }
 0x34d   : > { %v3253_v41 = vpack.c.b16 %v3252_v4, %v5241_v10  ;;  %v4002_v10 = vld [vmem:[%s5323_s5 + $0x8] sm:$0xff]  }
 0x34f   : > { %3895 = vmatmul.mubr.msk.bf16.vlgmr.msra.gmra.mxu1 %vm3263_vm15, %v3253_v41 }
 0x350   : > { %3902 = vmatprep.mubr.msk.bf16.mxu1 %vm4155_vm5, %v5340_v36  ;;  %3899 = vmatpush3.bf16.msra.mxu1 %v4002_v10 }
 0x351   : > { %3900 = vmatprep.subr.bf16.mxu1 %v5340_v36 }
 0x354   : > { %3901 = vmatpush3.bf16.msra.mxu1 %v4003_v7 }
 0x40f   : > { %v3304_v33 = vpop.f32.mrf.mxu1 }
 0x410   : > { %v3311_v26 = vmul.f32 %v3304_v33, %v3304_v33 }
 0x411   : > { %v3896_v58 = vpop.f32.mrf.mxu1 }
 0x412   : > { %v3313_v43 = vsel %vm560_vm0, %v3311_v26, 0.0 }
 0x413   : > { %3314 = vadd.xlane.f32.xlu1 %v3313_v43  ;;  %v3307_v61 = vpop.f32.mrf.mxu1 }
 0x414   : > { %v3312_v50 = vmul.f32 %v3307_v61, %v3307_v61 }
 0x415   : > { %v3897_v24 = vpop.f32.mrf.mxu1 }
 0x416   : > { %v3316_v3 = vsel %vm560_vm0, %v3312_v50, 0.0 }
 0x417   : > { %3317 = vadd.xlane.f32.xlu0 %v3316_v3 }
 0x49c   : > { %v3315_v34 = vpop.xlane.xlu1 %3314 }
 0x49d   : > { %v3319_v59 = vadd.f32 1.0, %v3315_v34  ;;  %v3327_v57 = vadd.f32 1e-09, %v3315_v34 }
 0x49f   : > { %4036 = vrcp.f32 %v3319_v59 }
 0x4a0   : > { %v3318_v16 = vpop.xlane.xlu0 %3317 }
 0x4a1   : > { %v3320_v0 = vadd.f32 1.0, %v3318_v16  ;;  %v3328_v23 = vadd.f32 1e-09, %v3318_v16 }
 0x4a3   : > { %4038 = vrcp.f32 %v3320_v0 }
 0x4a4   : > { %4040 = vrsqrt.f32 %v3327_v57 }
 0x4a5   : > { %4042 = vrsqrt.f32 %v3328_v23 }
 0x4ac   : > { %v4037_v51 = vpop.eup %4036 }
 0x4ad   : > { %v3322_v1 = vmul.f32 %v4037_v51, %v3315_v34 }
 0x4af   : > { %v3325_v52 = vmul.f32 %v3322_v1, %v3304_v33 }
 0x4b0   : > { %v4039_v48 = vpop.eup %4038 }
 0x4b1   : > { %v3324_v53 = vmul.f32 %v4039_v48, %v3318_v16  ;;  %v4041_v60 = vpop.eup %4040 }
 0x4b2   : > { %v4043_v18 = vpop.eup %4042  ;;  %v3331_v36 = vmul.f32 %v4041_v60, %v3325_v52 }
 0x4b3   : > { %v3326_v32 = vmul.f32 %v3324_v53, %v3307_v61 }
 0x4b5   : > { %v3332_v6 = vmul.f32 %v4043_v18, %v3326_v32 }
 0x4b7   : > { %v3333_v39 = vpack.c.bf16 %v3332_v6, %v3331_v36 }
 0x4b9   : > { %3903 = vmatmul.mubr.msk.bf16.vlgmr.msra.gmra.mxu1 %vm560_vm0, %v3333_v39 }
 0x579   : > { %v3394_v28 = vpop.f32.mrf.mxu1 }
 0x57a   : > { %v3395_v40 = vadd.f32 %v3608_v19, %v3394_v28 }
 0x57b   : > { %v3904_v62 = vpop.f32.mrf.mxu1 }
 0x57c   : > { %v3612_v30 = vmul.f32 -1.442695, %v3395_v40 }
 0x57d   : > { %v3397_v27 = vpop.f32.mrf.mxu1 }
 0x57e   : > { %4044 = vpow2.f32 %v3612_v30  ;;  %v3398_v9 = vadd.f32 %v3608_v19, %v3397_v27 }
 0x57f   : > { %v3905_v46 = vpop.f32.mrf.mxu1 }
 0x580   : > { %v3613_v17 = vmul.f32 -1.442695, %v3398_v9 }
 0x582   : > { %4046 = vpow2.f32 %v3613_v17 }
 0x58b   : > { %v4045_v45 = vpop.eup %4044 }
 0x58c   : > { %v3407_v29 = vadd.f32 1.0, %v4045_v45 }
 0x58e   : > { %4048 = vrcp.f32 %v3407_v29 }
 0x58f   : > { %v4047_v47 = vpop.eup %4046 }
 0x590   : > { %v3408_v13 = vadd.f32 1.0, %v4047_v47 }
 0x592   : > { %4050 = vrcp.f32 %v3408_v13 }
 0x59b   : > { %v4049_v5 = vpop.eup %4048 }
 0x59c   : > { %3413 = vst [vmem:[%s311_s23] sm:$0xff] %v4049_v5 }
 0x59f   : > { %v4051_v38 = vpop.eup %4050 }
 0x5a0   : > { %3414 = vst [vmem:[%s311_s23 + $0x8] sm:$0xff] %v4051_v38 }
 0x5a1   : > { %4094 = shalt.err (!%p4091_p0)
}
 0x5a2   : > { %s4095_s18 = scalar_lea.hbm %s5273_s21, 256  ;;  %s4099_s22 = scalar_lea.hbm %s5325_s7, 512 }
 0x5a3   : > { %p4096_p2 = scmp.ne.s32.totalorder %s5273_s21, %s4095_s18  ;;  %p4100_p3 = scmp.lt.s32.totalorder %s5273_s21, %s5325_s7 }
 0x5a4   : > { %p4101_p6 = scmp.lt.s32.totalorder %s4099_s22, %s4095_s18 }
 0x5a5   : > { %p4097_p9 = pnand %p4096_p2, %p5349_p13 }
 0x5a6   : > { %p4102_p11 = por %p4101_p6, %p4100_p3 }
 0x5a7   : > { %p4098_p1 = pneg %p4097_p9 }
 0x5a9   : > { %p4103_p12 = pnand %p4102_p11, %p4098_p1 }
 0x5ab   : > { %4106 = shalt.err (!%p4103_p12)
}
 0x5ac   : > { %s4157_s19 = smov 128   ;;  %s4158_s8 = smov 8  }
 0x5ad   : > { %3912 = dma.vmem_to_hbm [thread:$0]  (%p5349_p13), %s5275_s29, 256, %s5273_s21, %s3416_s9, %s4157_s19, %s4157_s19, %s4158_s8  }
 0x5ae PF: > { %s3444_s28 = sand.u32 1, %s4133_s24   ;;  %p5350_p4 = scmp.ne.s32.totalorder %s5335_s14, 0 }
 0x5af   : > { %p5351_p5 = scmp.ge.s32.totalorder %s4145_s27, 2  ;;  %s3445_s16 = scalar_lea.sflag [#allocation4], %s3444_s28 }
 0x5b1   : > { %p3919_p7 = pnand %p5351_p5, %p5350_p4 }
 0x5b3   : > { %p3920_p8 = pneg %p3919_p7 }
 0x5b5   : > { %4128 = dma.done.wait (%p3920_p8), %s3445_s16, 256  }
 0x5b6   : > { %4130 = vsyncadd (%p3920_p8), %s3445_s16, 4294967040  ;;  %p20_p10 = scmp.ge.s32.totalorder %s4224_s30, 4   ;;  %s5352_s24 = smov %s4137_s25 }
 0x5b7   : > { %s5353_s25 = smov %s4141_s26  ;;  %s5354_s26 = smov %s4236_s10 }
 0x5b8   : > { %s5355_s27 = smov %s4224_s30  ;;  %22 = sbr.rel (!%p20_p10) target bundleno = 5 (0x5), region = 96 }
 0x5bd   :  { %3450 = vsyncpa [#allocation3], 1 }
 0x5be   :  { %3452 = vsyncpa [#allocation3 + $0x1], 1 }
 0x5bf   :  { %3453 = vsyncpa [#allocation4], 1 }
 0x5c0   :  { %3455 = vsyncpa [#allocation4 + $0x1], 1 }

</bundles_post_ra>
